<compile_context>
chip_gen: v7x
topology: tpu7x:2x2x1
jax: 0.10.0
libtpu: 0.0.40
codegen_flags: <defaults>
</compile_context>

<pallas_src>
import functools

import jax
import jax.numpy as jnp
from jax.experimental import pallas as pl
from jax.experimental.pallas import tpu as pltpu


def _round_up(x, m):
    return (x + m - 1) // m * m


def _choose_batch_tile(B, S, Epad):
    """Largest batch tile whose double-buffered bf16 emb tile fits ~8 MiB."""
    row_bytes = S * Epad * 2                       # bf16 bytes per batch row
    tb = max(1, (8 << 20) // (2 * row_bytes))
    tb = min(tb, 256, B)
    if tb < B:                                     # keep output block sublane-aligned
        tb = max(8, (tb // 8) * 8)
    return tb


def textcnn_kernel(emb_ref, w1_ref, b1_ref, w2_ref, b2_ref, w3_ref, b3_ref,
                   fcw1_ref, fcw2_ref, fcw3_ref, fcb_ref, out_ref, *,
                   kernel_sizes, n_class):
    emb = emb_ref[...]                              # (TB, S, Epad) bf16
    TB, S, Epad = emb.shape

    def conv_relu_pool(w_ref, b_ref, ks):
        s_out = S - ks + 1
        kpad = w_ref.shape[-1]
        # im2col along the lane axis; Epad is a multiple of 128 so every chunk
        # starts on a lane-tile boundary (no cross-lane relayout).
        win = jnp.concatenate(
            [emb[:, dt:dt + s_out, :] for dt in range(ks)], axis=-1)
        win = win.reshape(TB * s_out, ks * Epad)
        # Single deep MXU contraction per conv (depth ks*Epad), f32 accumulate.
        acc = jnp.dot(win, w_ref[...], preferred_element_type=jnp.float32)
        pooled = jnp.max(acc.reshape(TB, s_out, kpad), axis=1)   # max over time
        # relu is monotone, so bias + relu commute with the max-pool:
        # max_t relu(c_t + b) == relu(max_t c_t + b).  Padded K lanes stay 0.
        return jnp.maximum(pooled + b_ref[...], 0.0)             # (TB, Kpad) f32

    x1 = conv_relu_pool(w1_ref, b1_ref, kernel_sizes[0])
    x2 = conv_relu_pool(w2_ref, b2_ref, kernel_sizes[1])
    x3 = conv_relu_pool(w3_ref, b3_ref, kernel_sizes[2])

    # FC with the concat folded away: weight pre-split per conv branch.
    logits = (jnp.dot(x1, fcw1_ref[...], preferred_element_type=jnp.float32)
              + jnp.dot(x2, fcw2_ref[...], preferred_element_type=jnp.float32)
              + jnp.dot(x3, fcw3_ref[...], preferred_element_type=jnp.float32)
              + fcb_ref[...])                                    # (TB, Cpad)

    # Dropout is identity at inference.
    # log_softmax over the real classes only (padded class lanes -> -inf).
    col = jax.lax.broadcasted_iota(jnp.int32, logits.shape, 1)
    logits = jnp.where(col < n_class, logits, jnp.float32(-1e30))
    m = jnp.max(logits, axis=1, keepdims=True)
    z = logits - m
    lse = jnp.log(jnp.sum(jnp.exp(z), axis=1, keepdims=True))
    out_ref[...] = z - lse


def textcnn_forward(tokens, emb_table, params, kernel_sizes):
    """tokens: (B, S) int32; emb_table: (vocab, E) f32. Returns (B, n_class) f32."""
    B, S = tokens.shape
    E = emb_table.shape[1]
    K = params["b1"].shape[-1]
    n_class = params["fc_b"].shape[-1]

    Epad = _round_up(E, 128)
    Kpad = _round_up(K, 128)
    Cpad = _round_up(n_class, 128)

    # ---- one-time wrapper-side layout (runs under jit, not per grid step) ----
    emb_tab = jnp.pad(emb_table, ((0, 0), (0, Epad - E))).astype(jnp.bfloat16)
    emb = jnp.take(emb_tab, tokens.astype(jnp.int32), axis=0)   # (B, S, Epad) bf16
    # TODO(synk): fuse the embedding gather into the kernel (scalar-prefetched
    # token ids + per-row DMA from the HBM table) to avoid the HBM round trip
    # of the gathered embeddings.

    def conv_w(w):        # (K, ks, E) -> (ks*Epad, Kpad), rows in im2col order
        ks = w.shape[1]
        wt = jnp.transpose(w, (1, 2, 0))                        # (ks, E, K)
        wt = jnp.pad(wt, ((0, 0), (0, Epad - E), (0, Kpad - K)))
        return wt.reshape(ks * Epad, Kpad).astype(jnp.bfloat16)

    def conv_b(b):        # (1, K) -> (1, Kpad) f32
        return jnp.pad(b, ((0, 0), (0, Kpad - K))).astype(jnp.float32)

    fc_wt = params["fc_w"].T.astype(jnp.float32)                # (3K, n_class)

    def fc_chunk(i):      # (K, n_class) -> (Kpad, Cpad) f32
        c = fc_wt[i * K:(i + 1) * K, :]
        return jnp.pad(c, ((0, Kpad - K), (0, Cpad - n_class)))

    fcb = jnp.pad(params["fc_b"].astype(jnp.float32),
                  ((0, 0), (0, Cpad - n_class)))

    consts = (conv_w(params["w1"]), conv_b(params["b1"]),
              conv_w(params["w2"]), conv_b(params["b2"]),
              conv_w(params["w3"]), conv_b(params["b3"]),
              fc_chunk(0), fc_chunk(1), fc_chunk(2), fcb)

    # ---- batch tiling -------------------------------------------------------
    TB = _choose_batch_tile(B, S, Epad)
    Bp = _round_up(B, TB)
    if Bp != B:
        emb = jnp.pad(emb, ((0, Bp - B), (0, 0), (0, 0)))
    grid = (Bp // TB,)

    resident = lambda a: pl.BlockSpec(a.shape, lambda i: (0, 0))  # stays in VMEM
    in_specs = ([pl.BlockSpec((TB, S, Epad), lambda i: (i, 0, 0))]
                + [resident(a) for a in consts])
    out_specs = pl.BlockSpec((TB, Cpad), lambda i: (i, 0))

    # Explicit scoped-VMEM budget: double-buffered emb/out tiles + resident
    # weights + headroom for in-kernel temporaries (im2col windows, f32 acc).
    w_bytes = sum(a.size * a.dtype.itemsize for a in consts)
    emb_tile = TB * S * Epad * 2
    out_tile = TB * Cpad * 4
    tmp_bytes = 3 * TB * S * (max(kernel_sizes) * Epad * 2 + Kpad * 4)
    need = 2 * (emb_tile + out_tile) + 2 * w_bytes + tmp_bytes + (2 << 20)
    vmem_limit = int(min(max(need, 16 << 20), 40 << 20))

    kernel = functools.partial(
        textcnn_kernel,
        kernel_sizes=tuple(int(k) for k in kernel_sizes),
        n_class=int(n_class))

    out = pl.pallas_call(
        kernel,
        out_shape=jax.ShapeDtypeStruct((Bp, Cpad), jnp.float32),
        grid=grid,
        in_specs=in_specs,
        out_specs=out_specs,
        compiler_params=pltpu.CompilerParams(
            dimension_semantics=("parallel",),
            vmem_limit_bytes=vmem_limit),
    )(emb, *consts)

    return out[:B, :n_class]


def textcnn_reference(tokens, emb_table, params, kernel_sizes):
    """Pure-JAX f32 reference matching the PyTorch module."""
    emb = jnp.take(emb_table, tokens.astype(jnp.int32), axis=0)  # (B, S, E)
    S = emb.shape[1]
    feats = []
    for w, b in ((params["w1"], params["b1"]),
                 (params["w2"], params["b2"]),
                 (params["w3"], params["b3"])):
        ks = w.shape[1]
        s_out = S - ks + 1
        conv = jnp.stack(
            [jnp.einsum("bte,kte->bk", emb[:, p:p + ks, :], w)
             for p in range(s_out)], axis=1)                     # (B, s_out, K)
        conv = jax.nn.relu(conv + b.reshape(1, 1, -1))
        feats.append(jnp.max(conv, axis=1))                      # (B, K)
    feat = jnp.concatenate(feats, axis=1)                        # (B, 3K)
    logits = feat @ params["fc_w"].T + params["fc_b"]
    return jax.nn.log_softmax(logits, axis=1)


def init_params(key, vocab_size, embedding_dim, kernel_num, kernel_sizes, n_class):
    ks = jax.random.split(key, 10)
    scale = 0.1
    p = {}
    emb_table = jax.random.normal(ks[0], (vocab_size, embedding_dim), jnp.float32) * scale
    p["w1"] = jax.random.normal(ks[1], (kernel_num, kernel_sizes[0], embedding_dim), jnp.float32) * scale
    p["b1"] = jax.random.normal(ks[2], (1, kernel_num), jnp.float32) * scale
    p["w2"] = jax.random.normal(ks[3], (kernel_num, kernel_sizes[1], embedding_dim), jnp.float32) * scale
    p["b2"] = jax.random.normal(ks[4], (1, kernel_num), jnp.float32) * scale
    p["w3"] = jax.random.normal(ks[5], (kernel_num, kernel_sizes[2], embedding_dim), jnp.float32) * scale
    p["b3"] = jax.random.normal(ks[6], (1, kernel_num), jnp.float32) * scale
    p["fc_w"] = jax.random.normal(ks[7], (n_class, 3 * kernel_num), jnp.float32) * scale  # torch layout
    p["fc_b"] = jax.random.normal(ks[8], (1, n_class), jnp.float32) * scale
    return emb_table, p


if __name__ == "__main__":
    # small, forward-consistent config
    vocab_size = 50
    embedding_dim = 32
    kernel_num = 8
    kernel_sizes = (3, 4, 5)
    n_class = 4
    B, S = 2, 16

    key = jax.random.PRNGKey(0)
    k_tok, k_par = jax.random.split(key)
    tokens = jax.random.randint(k_tok, (B, S), 0, vocab_size, dtype=jnp.int32)
    emb_table, params = init_params(k_par, vocab_size, embedding_dim,
                                    kernel_num, kernel_sizes, n_class)

    fwd = jax.jit(textcnn_forward, static_argnums=(3,))
    out = jax.block_until_ready(fwd(tokens, emb_table, params, kernel_sizes))

    assert out.shape == (B, n_class)
    assert bool(jnp.all(jnp.isfinite(out)))
    # log_softmax rows must sum to 1 in prob space
    assert jnp.allclose(jnp.sum(jnp.exp(out), axis=1), 1.0, atol=1e-4)
    # matches the f32 pure-JAX reference (bf16 matmul inputs -> loose tol)
    ref = textcnn_reference(tokens, emb_table, params, kernel_sizes)
    assert jnp.allclose(out, ref, atol=2e-2), (out, ref)
    print("KERNEL_OK")
</pallas_src>

<mosaic_0001>
module attributes {stable_mosaic.version = 11 : i64} {
  func.func @textcnn_kernel(%arg0: i32, %arg1: memref<2x16x128xbf16, #tpu.memory_space<vmem>>, %arg2: memref<384x128xbf16, #tpu.memory_space<vmem>>, %arg3: memref<1x128xf32, #tpu.memory_space<vmem>>, %arg4: memref<512x128xbf16, #tpu.memory_space<vmem>>, %arg5: memref<1x128xf32, #tpu.memory_space<vmem>>, %arg6: memref<640x128xbf16, #tpu.memory_space<vmem>>, %arg7: memref<1x128xf32, #tpu.memory_space<vmem>>, %arg8: memref<128x128xf32, #tpu.memory_space<vmem>>, %arg9: memref<128x128xf32, #tpu.memory_space<vmem>>, %arg10: memref<128x128xf32, #tpu.memory_space<vmem>>, %arg11: memref<1x128xf32, #tpu.memory_space<vmem>>, %arg12: memref<2x128xf32, #tpu.memory_space<vmem>>) attributes {dimension_semantics = [#tpu.dimension_semantics<parallel>], iteration_bounds = array<i64: 1>, scalar_prefetch = 0 : i64, scratch_operands = 0 : i64, tpu.core_type = #tpu.core_type<tc>, window_params = [{transform_indices = @transform_0, window_bounds = array<i64: 2, 16, 128>}, {pipeline_mode = #tpu.pipeline_mode<synchronous>, transform_indices = @transform_1, window_bounds = array<i64: 384, 128>}, {pipeline_mode = #tpu.pipeline_mode<synchronous>, transform_indices = @transform_2, window_bounds = array<i64: 1, 128>}, {pipeline_mode = #tpu.pipeline_mode<synchronous>, transform_indices = @transform_3, window_bounds = array<i64: 512, 128>}, {pipeline_mode = #tpu.pipeline_mode<synchronous>, transform_indices = @transform_4, window_bounds = array<i64: 1, 128>}, {pipeline_mode = #tpu.pipeline_mode<synchronous>, transform_indices = @transform_5, window_bounds = array<i64: 640, 128>}, {pipeline_mode = #tpu.pipeline_mode<synchronous>, transform_indices = @transform_6, window_bounds = array<i64: 1, 128>}, {pipeline_mode = #tpu.pipeline_mode<synchronous>, transform_indices = @transform_7, window_bounds = array<i64: 128, 128>}, {pipeline_mode = #tpu.pipeline_mode<synchronous>, transform_indices = @transform_8, window_bounds = array<i64: 128, 128>}, {pipeline_mode = #tpu.pipeline_mode<synchronous>, transform_indices = @transform_9, window_bounds = array<i64: 128, 128>}, {pipeline_mode = #tpu.pipeline_mode<synchronous>, transform_indices = @transform_10, window_bounds = array<i64: 1, 128>}, {transform_indices = @transform_11, window_bounds = array<i64: 2, 128>}]} {
    %c0 = arith.constant 0 : index
    %c0_0 = arith.constant 0 : index
    %c0_1 = arith.constant 0 : index
    %0 = vector.load %arg1[%c0, %c0_0, %c0_1] : memref<2x16x128xbf16, #tpu.memory_space<vmem>>, vector<2x16x128xbf16>
    %1 = vector.extract_strided_slice %0 {offsets = [0, 0, 0], sizes = [2, 14, 128], strides = [1, 1, 1]} : vector<2x16x128xbf16> to vector<2x14x128xbf16>
    %2 = vector.extract_strided_slice %0 {offsets = [0, 1, 0], sizes = [2, 14, 128], strides = [1, 1, 1]} : vector<2x16x128xbf16> to vector<2x14x128xbf16>
    %3 = vector.extract_strided_slice %0 {offsets = [0, 2, 0], sizes = [2, 14, 128], strides = [1, 1, 1]} : vector<2x16x128xbf16> to vector<2x14x128xbf16>
    %4 = tpu.concatenate %1, %2, %3 in 2 : vector<2x14x128xbf16>, vector<2x14x128xbf16>, vector<2x14x128xbf16> -> vector<2x14x384xbf16>
    %5 = vector.shape_cast %4 : vector<2x14x384xbf16> to vector<28x384xbf16>
    %c0_2 = arith.constant 0 : index
    %c0_3 = arith.constant 0 : index
    %6 = vector.load %arg2[%c0_2, %c0_3] : memref<384x128xbf16, #tpu.memory_space<vmem>>, vector<384x128xbf16>
    %cst = arith.constant dense<0.000000e+00> : vector<28x128xf32>
    %7 = tpu.matmul %5, %6, %cst {dimension_numbers = #tpu.dot_dimension_numbers<[1], [0], [0], [1], [0, 0, 1, 1], [], []>} : vector<28x384xbf16>, vector<384x128xbf16>, vector<28x128xf32> -> vector<28x128xf32>
    %8 = vector.shape_cast %7 : vector<28x128xf32> to vector<2x14x128xf32>
    %cst_4 = arith.constant dense<0xFF800000> : vector<2x128xf32>
    %9 = vector.multi_reduction <maximumf>, %8, %cst_4 [1] : vector<2x14x128xf32> to vector<2x128xf32>
    %c0_5 = arith.constant 0 : index
    %c0_6 = arith.constant 0 : index
    %10 = vector.load %arg3[%c0_5, %c0_6] : memref<1x128xf32, #tpu.memory_space<vmem>>, vector<1x128xf32>
    %11 = vector.broadcast %10 : vector<1x128xf32> to vector<2x128xf32>
    %12 = arith.addf %9, %11 : vector<2x128xf32>
    %cst_7 = arith.constant 0.000000e+00 : f32
    %13 = vector.broadcast %cst_7 : f32 to vector<2x128xf32>
    %14 = arith.maximumf %12, %13 : vector<2x128xf32>
    %15 = vector.extract_strided_slice %0 {offsets = [0, 0, 0], sizes = [2, 13, 128], strides = [1, 1, 1]} : vector<2x16x128xbf16> to vector<2x13x128xbf16>
    %16 = vector.extract_strided_slice %0 {offsets = [0, 1, 0], sizes = [2, 13, 128], strides = [1, 1, 1]} : vector<2x16x128xbf16> to vector<2x13x128xbf16>
    %17 = vector.extract_strided_slice %0 {offsets = [0, 2, 0], sizes = [2, 13, 128], strides = [1, 1, 1]} : vector<2x16x128xbf16> to vector<2x13x128xbf16>
    %18 = vector.extract_strided_slice %0 {offsets = [0, 3, 0], sizes = [2, 13, 128], strides = [1, 1, 1]} : vector<2x16x128xbf16> to vector<2x13x128xbf16>
    %19 = tpu.concatenate %15, %16, %17, %18 in 2 : vector<2x13x128xbf16>, vector<2x13x128xbf16>, vector<2x13x128xbf16>, vector<2x13x128xbf16> -> vector<2x13x512xbf16>
    %20 = vector.shape_cast %19 : vector<2x13x512xbf16> to vector<26x512xbf16>
    %c0_8 = arith.constant 0 : index
    %c0_9 = arith.constant 0 : index
    %21 = vector.load %arg4[%c0_8, %c0_9] : memref<512x128xbf16, #tpu.memory_space<vmem>>, vector<512x128xbf16>
    %cst_10 = arith.constant dense<0.000000e+00> : vector<26x128xf32>
    %22 = tpu.matmul %20, %21, %cst_10 {dimension_numbers = #tpu.dot_dimension_numbers<[1], [0], [0], [1], [0, 0, 1, 1], [], []>} : vector<26x512xbf16>, vector<512x128xbf16>, vector<26x128xf32> -> vector<26x128xf32>
    %23 = vector.shape_cast %22 : vector<26x128xf32> to vector<2x13x128xf32>
    %cst_11 = arith.constant dense<0xFF800000> : vector<2x128xf32>
    %24 = vector.multi_reduction <maximumf>, %23, %cst_11 [1] : vector<2x13x128xf32> to vector<2x128xf32>
    %c0_12 = arith.constant 0 : index
    %c0_13 = arith.constant 0 : index
    %25 = vector.load %arg5[%c0_12, %c0_13] : memref<1x128xf32, #tpu.memory_space<vmem>>, vector<1x128xf32>
    %26 = vector.broadcast %25 : vector<1x128xf32> to vector<2x128xf32>
    %27 = arith.addf %24, %26 : vector<2x128xf32>
    %cst_14 = arith.constant 0.000000e+00 : f32
    %28 = vector.broadcast %cst_14 : f32 to vector<2x128xf32>
    %29 = arith.maximumf %27, %28 : vector<2x128xf32>
    %30 = vector.extract_strided_slice %0 {offsets = [0, 0, 0], sizes = [2, 12, 128], strides = [1, 1, 1]} : vector<2x16x128xbf16> to vector<2x12x128xbf16>
    %31 = vector.extract_strided_slice %0 {offsets = [0, 1, 0], sizes = [2, 12, 128], strides = [1, 1, 1]} : vector<2x16x128xbf16> to vector<2x12x128xbf16>
    %32 = vector.extract_strided_slice %0 {offsets = [0, 2, 0], sizes = [2, 12, 128], strides = [1, 1, 1]} : vector<2x16x128xbf16> to vector<2x12x128xbf16>
    %33 = vector.extract_strided_slice %0 {offsets = [0, 3, 0], sizes = [2, 12, 128], strides = [1, 1, 1]} : vector<2x16x128xbf16> to vector<2x12x128xbf16>
    %34 = vector.extract_strided_slice %0 {offsets = [0, 4, 0], sizes = [2, 12, 128], strides = [1, 1, 1]} : vector<2x16x128xbf16> to vector<2x12x128xbf16>
    %35 = tpu.concatenate %30, %31, %32, %33, %34 in 2 : vector<2x12x128xbf16>, vector<2x12x128xbf16>, vector<2x12x128xbf16>, vector<2x12x128xbf16>, vector<2x12x128xbf16> -> vector<2x12x640xbf16>
    %36 = vector.shape_cast %35 : vector<2x12x640xbf16> to vector<24x640xbf16>
    %c0_15 = arith.constant 0 : index
    %c0_16 = arith.constant 0 : index
    %37 = vector.load %arg6[%c0_15, %c0_16] : memref<640x128xbf16, #tpu.memory_space<vmem>>, vector<640x128xbf16>
    %cst_17 = arith.constant dense<0.000000e+00> : vector<24x128xf32>
    %38 = tpu.matmul %36, %37, %cst_17 {dimension_numbers = #tpu.dot_dimension_numbers<[1], [0], [0], [1], [0, 0, 1, 1], [], []>} : vector<24x640xbf16>, vector<640x128xbf16>, vector<24x128xf32> -> vector<24x128xf32>
    %39 = vector.shape_cast %38 : vector<24x128xf32> to vector<2x12x128xf32>
    %cst_18 = arith.constant dense<0xFF800000> : vector<2x128xf32>
    %40 = vector.multi_reduction <maximumf>, %39, %cst_18 [1] : vector<2x12x128xf32> to vector<2x128xf32>
    %c0_19 = arith.constant 0 : index
    %c0_20 = arith.constant 0 : index
    %41 = vector.load %arg7[%c0_19, %c0_20] : memref<1x128xf32, #tpu.memory_space<vmem>>, vector<1x128xf32>
    %42 = vector.broadcast %41 : vector<1x128xf32> to vector<2x128xf32>
    %43 = arith.addf %40, %42 : vector<2x128xf32>
    %cst_21 = arith.constant 0.000000e+00 : f32
    %44 = vector.broadcast %cst_21 : f32 to vector<2x128xf32>
    %45 = arith.maximumf %43, %44 : vector<2x128xf32>
    %c0_22 = arith.constant 0 : index
    %c0_23 = arith.constant 0 : index
    %46 = vector.load %arg8[%c0_22, %c0_23] : memref<128x128xf32, #tpu.memory_space<vmem>>, vector<128x128xf32>
    %cst_24 = arith.constant dense<0.000000e+00> : vector<2x128xf32>
    %47 = tpu.matmul %14, %46, %cst_24 {dimension_numbers = #tpu.dot_dimension_numbers<[1], [0], [0], [1], [0, 0, 1, 1], [], []>} : vector<2x128xf32>, vector<128x128xf32>, vector<2x128xf32> -> vector<2x128xf32>
    %c0_25 = arith.constant 0 : index
    %c0_26 = arith.constant 0 : index
    %48 = vector.load %arg9[%c0_25, %c0_26] : memref<128x128xf32, #tpu.memory_space<vmem>>, vector<128x128xf32>
    %cst_27 = arith.constant dense<0.000000e+00> : vector<2x128xf32>
    %49 = tpu.matmul %29, %48, %cst_27 {dimension_numbers = #tpu.dot_dimension_numbers<[1], [0], [0], [1], [0, 0, 1, 1], [], []>} : vector<2x128xf32>, vector<128x128xf32>, vector<2x128xf32> -> vector<2x128xf32>
    %50 = arith.addf %47, %49 : vector<2x128xf32>
    %c0_28 = arith.constant 0 : index
    %c0_29 = arith.constant 0 : index
    %51 = vector.load %arg10[%c0_28, %c0_29] : memref<128x128xf32, #tpu.memory_space<vmem>>, vector<128x128xf32>
    %cst_30 = arith.constant dense<0.000000e+00> : vector<2x128xf32>
    %52 = tpu.matmul %45, %51, %cst_30 {dimension_numbers = #tpu.dot_dimension_numbers<[1], [0], [0], [1], [0, 0, 1, 1], [], []>} : vector<2x128xf32>, vector<128x128xf32>, vector<2x128xf32> -> vector<2x128xf32>
    %53 = arith.addf %50, %52 : vector<2x128xf32>
    %c0_31 = arith.constant 0 : index
    %c0_32 = arith.constant 0 : index
    %54 = vector.load %arg11[%c0_31, %c0_32] : memref<1x128xf32, #tpu.memory_space<vmem>>, vector<1x128xf32>
    %55 = vector.broadcast %54 : vector<1x128xf32> to vector<2x128xf32>
    %56 = arith.addf %53, %55 : vector<2x128xf32>
    %57 = tpu.iota {dimensions = array<i32: 1>} : vector<2x128xi32>
    %c4_i32 = arith.constant 4 : i32
    %58 = vector.broadcast %c4_i32 : i32 to vector<2x128xi32>
    %59 = arith.cmpi slt, %57, %58 : vector<2x128xi32>
    %cst_33 = arith.constant -1.000000e+30 : f32
    %60 = vector.broadcast %cst_33 : f32 to vector<2x128xf32>
    %61 = arith.select %59, %56, %60 : vector<2x128xi1>, vector<2x128xf32>
    %cst_34 = arith.constant dense<0xFF800000> : vector<2xf32>
    %62 = vector.multi_reduction <maximumf>, %61, %cst_34 [1] : vector<2x128xf32> to vector<2xf32>
    %63 = vector.shape_cast %62 : vector<2xf32> to vector<2x1xf32>
    %64 = vector.broadcast %63 : vector<2x1xf32> to vector<2x128xf32>
    %65 = arith.subf %61, %64 : vector<2x128xf32>
    %66 = math.exp %65 : vector<2x128xf32>
    %cst_35 = arith.constant dense<0.000000e+00> : vector<2xf32>
    %67 = vector.multi_reduction <add>, %66, %cst_35 [1] : vector<2x128xf32> to vector<2xf32>
    %68 = vector.shape_cast %67 : vector<2xf32> to vector<2x1xf32>
    %69 = math.log %68 : vector<2x1xf32>
    %70 = vector.broadcast %69 : vector<2x1xf32> to vector<2x128xf32>
    %71 = arith.subf %65, %70 : vector<2x128xf32>
    %c0_36 = arith.constant 0 : index
    %c0_37 = arith.constant 0 : index
    %72 = vector.load %arg12[%c0_36, %c0_37] : memref<2x128xf32, #tpu.memory_space<vmem>>, vector<2x128xf32>
    tpu.vector_store %arg12[%c0_36, %c0_37], %71 {strides = array<i32>} : memref<2x128xf32, #tpu.memory_space<vmem>>, vector<2x128xf32>,
    return
  }
  func.func @transform_0(%arg0: i32) -> (i32, i32, i32) {
    %c0_i32 = arith.constant 0 : i32
    %c0_i32_0 = arith.constant 0 : i32
    %c0_i32_1 = arith.constant 0 : i32
    return %arg0, %c0_i32, %c0_i32_0 : i32, i32, i32
  }
  func.func @transform_1(%arg0: i32) -> (i32, i32) {
    %c0_i32 = arith.constant 0 : i32
    %c0_i32_0 = arith.constant 0 : i32
    %c0_i32_1 = arith.constant 0 : i32
    return %c0_i32, %c0_i32_0 : i32, i32
  }
  func.func @transform_2(%arg0: i32) -> (i32, i32) {
    %c0_i32 = arith.constant 0 : i32
    %c0_i32_0 = arith.constant 0 : i32
    %c0_i32_1 = arith.constant 0 : i32
    return %c0_i32, %c0_i32_0 : i32, i32
  }
  func.func @transform_3(%arg0: i32) -> (i32, i32) {
    %c0_i32 = arith.constant 0 : i32
    %c0_i32_0 = arith.constant 0 : i32
    %c0_i32_1 = arith.constant 0 : i32
    return %c0_i32, %c0_i32_0 : i32, i32
  }
  func.func @transform_4(%arg0: i32) -> (i32, i32) {
    %c0_i32 = arith.constant 0 : i32
    %c0_i32_0 = arith.constant 0 : i32
    %c0_i32_1 = arith.constant 0 : i32
    return %c0_i32, %c0_i32_0 : i32, i32
  }
  func.func @transform_5(%arg0: i32) -> (i32, i32) {
    %c0_i32 = arith.constant 0 : i32
    %c0_i32_0 = arith.constant 0 : i32
    %c0_i32_1 = arith.constant 0 : i32
    return %c0_i32, %c0_i32_0 : i32, i32
  }
  func.func @transform_6(%arg0: i32) -> (i32, i32) {
    %c0_i32 = arith.constant 0 : i32
    %c0_i32_0 = arith.constant 0 : i32
    %c0_i32_1 = arith.constant 0 : i32
    return %c0_i32, %c0_i32_0 : i32, i32
  }
  func.func @transform_7(%arg0: i32) -> (i32, i32) {
    %c0_i32 = arith.constant 0 : i32
    %c0_i32_0 = arith.constant 0 : i32
    %c0_i32_1 = arith.constant 0 : i32
    return %c0_i32, %c0_i32_0 : i32, i32
  }
  func.func @transform_8(%arg0: i32) -> (i32, i32) {
    %c0_i32 = arith.constant 0 : i32
    %c0_i32_0 = arith.constant 0 : i32
    %c0_i32_1 = arith.constant 0 : i32
    return %c0_i32, %c0_i32_0 : i32, i32
  }
  func.func @transform_9(%arg0: i32) -> (i32, i32) {
    %c0_i32 = arith.constant 0 : i32
    %c0_i32_0 = arith.constant 0 : i32
    %c0_i32_1 = arith.constant 0 : i32
    return %c0_i32, %c0_i32_0 : i32, i32
  }
  func.func @transform_10(%arg0: i32) -> (i32, i32) {
    %c0_i32 = arith.constant 0 : i32
    %c0_i32_0 = arith.constant 0 : i32
    %c0_i32_1 = arith.constant 0 : i32
    return %c0_i32, %c0_i32_0 : i32, i32
  }
  func.func @transform_11(%arg0: i32) -> (i32, i32) {
    %c0_i32 = arith.constant 0 : i32
    %c0_i32_0 = arith.constant 0 : i32
    return %arg0, %c0_i32 : i32, i32
  }
}

</mosaic_0001>

<bundles_post_ra>
// kernel: textcnn_forward.1
= control target key start
LH: loop header
LB: loop body
LE: loop exit
PB: predicated region body
PF: predicated region fallthrough
CT: control target
= control target key end

     0   :  { %v76_v21 = vlaneseq  ;;  %v3483_v30 = vmov 1966171168   ;;  %s4305_s0 = inlined_call_operand.vmem [shape: bf16[2,16,128], index: 0, kind: input, shape index: {}]   ;;  %s4306_s1 = inlined_call_operand.vmem [shape: bf16[384,128], index: 1, kind: input, shape index: {}]   ;;  %s4307_s2 = inlined_call_operand.vmem [shape: f32[1,128], index: 2, kind: input, shape index: {}]   ;;  %s4308_s3 = inlined_call_operand.vmem [shape: bf16[512,128], index: 3, kind: input, shape index: {}]   ;;  %s4309_s4 = inlined_call_operand.vmem [shape: f32[1,128], index: 4, kind: input, shape index: {}]   ;;  %s4310_s5 = inlined_call_operand.vmem [shape: bf16[640,128], index: 5, kind: input, shape index: {}]   ;;  %s4311_s6 = inlined_call_operand.vmem [shape: f32[1,128], index: 6, kind: input, shape index: {}]   ;;  %s4312_s7 = inlined_call_operand.vmem [shape: f32[128,128], index: 7, kind: input, shape index: {}]   ;;  %s4313_s8 = inlined_call_operand.vmem [shape: f32[128,128], index: 8, kind: input, shape index: {}]   ;;  %s4314_s9 = inlined_call_operand.vmem [shape: f32[128,128], index: 9, kind: input, shape index: {}]   ;;  %s4315_s10 = inlined_call_operand.vmem [shape: f32[1,128], index: 10, kind: input, shape index: {}]   ;;  %s4316_s11 = inlined_call_operand.hbm [shape: f32[2,128], index: 11, kind: output, shape index: {}]  }
   0x1   :  { %v3357_v0 = vld [vmem:[%s4306_s1 + $0x40] sm:$0xff]   ;;  %v3360_v3 = vld [vmem:[%s4306_s1 + $0x48] sm:$0xff]   ;;  %v3363_v6 = vld [vmem:[%s4306_s1 + $0x50] sm:$0xff]   ;;  %v74_v31 = vunpack.c.l.s4 %v3483_v30 }
   0x2   :  { %v3358_v1 = vld [vmem:[%s4306_s1 + $0x80] sm:$0xff]   ;;  %2923 = vmatprep.subr.bf16.mxu0 %v3357_v0  ;;  %v3361_v4 = vld [vmem:[%s4306_s1 + $0x88] sm:$0xff]   ;;  %v3364_v7 = vld [vmem:[%s4306_s1 + $0x90] sm:$0xff]   ;;  %v3635_v32 = vshrl.u32 %v76_v21, 7 }
   0x3   :  { %v3359_v2 = vld [vmem:[%s4306_s1] sm:$0xff]   ;;  %3134 = vmatprep.subr.bf16.mxu1 %v3358_v1  ;;  %v3362_v5 = vld [vmem:[%s4306_s1 + $0x8] sm:$0xff]   ;;  %v3365_v8 = vld [vmem:[%s4306_s1 + $0x10] sm:$0xff]   ;;  %v75_v40 = vunpack.c.0.s8 %v74_v31 }
   0x4   :  { %2924 = vmatpush3.bf16.msra.mxu0 %v3359_v2  ;;  %3135 = vmatpush3.bf16.msra.mxu1 %v3358_v1  ;;  %v3366_v9 = vld [vmem:[%s4306_s1 + $0x58] sm:$0xff]   ;;  %v3369_v12 = vld [vmem:[%s4306_s1 + $0x60] sm:$0xff]   ;;  %v3372_v15 = vld [vmem:[%s4306_s1 + $0x68] sm:$0xff]  }
   0x5   :  { %2925 = vmatprep.subr.bf16.mxu0 %v3360_v3  ;;  %3136 = vmatprep.subr.bf16.mxu1 %v3361_v4  ;;  %v3367_v10 = vld [vmem:[%s4306_s1 + $0x98] sm:$0xff]   ;;  %v3370_v13 = vld [vmem:[%s4306_s1 + $0xa0] sm:$0xff]   ;;  %v3373_v16 = vld [vmem:[%s4306_s1 + $0xa8] sm:$0xff]   ;;  %v3655_v46 = vsub.s32 %v75_v40, %v3635_v32 }
   0x6   :  { %v3368_v11 = vld [vmem:[%s4306_s1 + $0x18] sm:$0xff]   ;;  %v3371_v14 = vld [vmem:[%s4306_s1 + $0x20] sm:$0xff]   ;;  %v3374_v17 = vld [vmem:[%s4306_s1 + $0x28] sm:$0xff]  }
   0x7   :  { %v3375_v18 = vld [vmem:[%s4306_s1 + $0x70] sm:$0xff]   ;;  %v3378_v22 = vld [vmem:[%s4306_s1 + $0x78] sm:$0xff]   ;;  %v40_v24 = vld [vmem:[%s4305_s0] sm:$0xf] }
   0x8   :  { %2926 = vmatpush3.bf16.msra.mxu0 %v3362_v5  ;;  %3137 = vmatpush3.bf16.msra.mxu1 %v3361_v4  ;;  %v3376_v19 = vld [vmem:[%s4306_s1 + $0xb0] sm:$0xff]   ;;  %v3379_v23 = vld [vmem:[%s4306_s1 + $0xb8] sm:$0xff]   ;;  %v41_v25 = vld [vmem:[%s4305_s0 + $0x4] sm:$0xf] }
   0x9   :  { %2927 = vmatprep.subr.bf16.mxu0 %v3363_v6  ;;  %3138 = vmatprep.subr.bf16.mxu1 %v3364_v7  ;;  %v3377_v20 = vld [vmem:[%s4306_s1 + $0x30] sm:$0xff]   ;;  %v42_v26 = vld [vmem:[%s4305_s0 + $0x8] sm:$0xf]  ;;  %v43_v27 = vld [vmem:[%s4305_s0 + $0xc] sm:$0xf]  ;;  %v3630_v28 = vcombine.low %v40_v24, %v41_v25 }
   0xa   :  { %v3632_v29 = vcombine.low %v42_v26, %v43_v27  ;;  %v3380_v33 = vld [vmem:[%s4306_s1 + $0x38] sm:$0xff]   ;;  %v3383_v41 = vld [vmem:[%s4308_s3 + $0x40] sm:$0xff]  }
   0xb   :  { %v55_v34 = vshrl.u32 %v3630_v28, 16  ;;  %v57_v35 = vshll.u32 %v3630_v28, 16  ;;  %v68_v36 = vrot.slane %v3630_v28, 1  ;;  %v3384_v44 = vld [vmem:[%s4308_s3 + $0xc0] sm:$0xff]  }
   0xc   :  { %2928 = vmatpush3.bf16.msra.mxu0 %v3365_v8  ;;  %3139 = vmatpush3.bf16.msra.mxu1 %v3364_v7  ;;  %v62_v37 = vshrl.u32 %v3632_v29, 16  ;;  %v64_v38 = vshll.u32 %v3632_v29, 16  ;;  %v3646_v39 = vrot.slane %v3632_v29, 1 }
   0xd   :  { %2929 = vmatprep.subr.bf16.mxu0 %v3366_v9  ;;  %3140 = vmatprep.subr.bf16.mxu1 %v3367_v10  ;;  %v59_v42 = vrot.slane %v57_v35, 1  ;;  %v72_v43 = vcombine.high %v68_v36, %v68_v36  ;;  %v784_v49 = vrot.slane %v55_v34, 1  ;;  %v93_v51 = vrot.slane %v68_v36, %v3655_v46 }
   0xe   :  { %v66_v45 = vrot.slane %v64_v38, 1  ;;  %v138_v47 = vcombine.high %v3646_v39, %v3646_v39  ;;  %v785_v53 = vrot.slane %v57_v35, 2  ;;  %v159_v56 = vrot.slane %v3646_v39, %v3655_v46 }
   0xf   :  { %v60_v48 = vor.u32 %v59_v42, %v55_v34  ;;  %v100_v52 = vrot.slane %v72_v43, %v3655_v46  ;;  %v787_v63 = vrot.slane %v62_v37, 1  ;;  %v788_v0 = vrot.slane %v64_v38, 2 }
  0x10   :  { %2930 = vmatpush3.bf16.msra.mxu0 %v3368_v11  ;;  %3141 = vmatpush3.bf16.msra.mxu1 %v3367_v10  ;;  %v67_v50 = vor.u32 %v66_v45, %v62_v37  ;;  %v166_v59 = vrot.slane %v138_v47, %v3655_v46  ;;  %v786_v60 = vor.u32 %v785_v53, %v784_v49 }
  0x11   :  { %2931 = vmatprep.subr.bf16.mxu0 %v3369_v12  ;;  %3142 = vmatprep.subr.bf16.mxu1 %v3370_v13  ;;  %v3661_v54 = vcombine.low %v40_v24, %v60_v48  ;;  %v3664_v55 = vcombine.high %v3630_v28, %v60_v48 }
  0x12   :  { %v3668_v57 = vcombine.low %v42_v26, %v67_v50  ;;  %v3671_v58 = vcombine.high %v3632_v29, %v67_v50  ;;  %v3690_v3 = vcombine.low %v68_v36, %v786_v60  ;;  %v3692_v4 = vcombine.high %v68_v36, %v786_v60 }
  0x13   :  { %v3676_v61 = vrot.slane %v3661_v54, %v3655_v46  ;;  %v3680_v62 = vrot.slane %v3664_v55, %v3655_v46 }
  0x14   :  { %2932 = vmatpush3.bf16.msra.mxu0 %v3371_v14  ;;  %3143 = vmatpush3.bf16.msra.mxu1 %v3370_v13  ;;  %v3684_v1 = vrot.slane %v3668_v57, %v3655_v46  ;;  %v3688_v2 = vrot.slane %v3671_v58, %v3655_v46  ;;  %v798_v31 = vrot.slane %v3690_v3, %v3655_v46 }
  0x15   :  { %2933 = vmatprep.subr.bf16.mxu0 %v3372_v15  ;;  %3144 = vmatprep.subr.bf16.mxu1 %v3373_v16  ;;  %v101_v5 = vcombine.low %v3676_v61, %v93_v51  ;;  %v102_v6 = vcombine.high %v3676_v61, %v93_v51  ;;  %v103_v7 = vcombine.low %v3680_v62, %v100_v52 }
  0x16   :  { %v104_v8 = vcombine.high %v3680_v62, %v100_v52  ;;  %v167_v9 = vcombine.low %v3684_v1, %v159_v56  ;;  %v168_v10 = vcombine.high %v3684_v1, %v159_v56  ;;  %v169_v11 = vcombine.low %v3688_v2, %v166_v59 }
  0x17   :  { %v170_v12 = vcombine.high %v3688_v2, %v166_v59  ;;  %v111_v13 = vrot.slane %v101_v5, %v3655_v46  ;;  %v118_v14 = vrot.slane %v103_v7, %v3655_v46  ;;  %v125_v15 = vrot.slane %v102_v6, %v3655_v46 }
  0x18   :  { %2934 = vmatpush3.bf16.msra.mxu0 %v3374_v17  ;;  %3145 = vmatpush3.bf16.msra.mxu1 %v3373_v16  ;;  %v132_v16 = vrot.slane %v104_v8, %v3655_v46  ;;  %v177_v17 = vrot.slane %v167_v9, %v3655_v46  ;;  %v806_v45 = vcombine.low %v3676_v61, %v798_v31 }
  0x19   :  { %2935 = vmatprep.subr.bf16.mxu0 %v3375_v18  ;;  %3146 = vmatprep.subr.bf16.mxu1 %v3376_v19  ;;  %v184_v18 = vrot.slane %v169_v11, %v3655_v46  ;;  %v2807_v24 = vcombine.high %v111_v13, %v125_v15  ;;  %v807_v50 = vcombine.high %v3676_v61, %v798_v31  ;;  %v3385_v61 = vld [vmem:[%s4308_s3] sm:$0xff]  }
  0x1a   :  { %v252_v25 = vcombine.low %v118_v14, %v132_v16  ;;  %v199_v26 = vcombine.high %v177_v17, %v177_v17  ;;  %v789_v9 = vor.u32 %v788_v0, %v787_v63 }
  0x1b   :  { %v200_v27 = vcombine.high %v184_v18, %v184_v18  ;;  %v267_v35 = vrot.slane %v2807_v24, %v3655_v46 }
  0x1c   :  { %2936 = vmatpush3.bf16.msra.mxu0 %v3377_v20  ;;  %3147 = vmatpush3.bf16.msra.mxu1 %v3376_v19  ;;  %v191_v19 = vrot.slane %v168_v10, %v3655_v46  ;;  %v198_v20 = vrot.slane %v170_v12, %v3655_v46  ;;  %v274_v36 = vrot.slane %v252_v25, %v3655_v46  ;;  %v3386_v12 = vld [vmem:[%s4308_s3 + $0x80] sm:$0xff]  }
  0x1d   :  { %2937 = vmatprep.subr.bf16.mxu0 %v3378_v22  ;;  %3148 = vmatprep.subr.bf16.mxu1 %v3379_v23  ;;  %v134_v22 = vcombine.high %v118_v14, %v118_v14 }
  0x1e   :  { %v201_v30 = vcombine.high %v191_v19, %v191_v19  ;;  %v317_v37 = vcombine.low %v191_v19, %v199_v26  ;;  %v319_v40 = vcombine.low %v198_v20, %v200_v27  ;;  %v3388_v19 = vld [vmem:[%s4308_s3 + $0xc8] sm:$0xff]   ;;  %v816_v20 = vrot.slane %v806_v45, %v3655_v46 }
  0x1f   :  { %v3390_v26 = vld [vmem:[%s4308_s3 + $0x88] sm:$0xff]   ;;  %v3761_v27 = vcombine.high %v3646_v39, %v789_v9 }
  0x20   :  { %2938 = vmatpush3.bf16.msra.mxu0 %v3380_v33  ;;  %3149 = vmatpush3.bf16.msra.mxu1 %v3379_v23  ;;  %v250_v23 = vcombine.low %v111_v13, %v125_v15  ;;  %v253_v33 = vcombine.low %v134_v22, %v177_v17  ;;  %v318_v38 = vcombine.low %v201_v30, %v184_v18  ;;  %v3387_v18 = vld [vmem:[%s4308_s3 + $0x48] sm:$0xff]   ;;  %v3391_v30 = vld [vmem:[%s4308_s3 + $0x50] sm:$0xff]  }
  0x21   :  { %2961 = vmatprep.subr.bf16.mxu0 %v3383_v41  ;;  %2989 = vmatprep.subr.bf16.mxu1 %v3384_v44  ;;  %v805_v41 = vrot.slane %v3692_v4, %v3655_v46  ;;  %v326_v47 = vrot.slane %v317_v37, %v3655_v46  ;;  %v340_v49 = vrot.slane %v319_v40, %v3655_v46  ;;  %v3393_v37 = vld [vmem:[%s4308_s3 + $0x10] sm:$0xff]  }
  0x22   :  { %v260_v34 = vrot.slane %v250_v23, %v3655_v46  ;;  %v281_v42 = vrot.slane %v253_v33, %v3655_v46  ;;  %v333_v48 = vrot.slane %v318_v38, %v3655_v46  ;;  %v830_v22 = vrot.slane %v807_v50, %v3655_v46  ;;  %v3389_v23 = vld [vmem:[%s4308_s3 + $0x8] sm:$0xff]   ;;  %v3396_v50 = vld [vmem:[%s4308_s3 + $0xd8] sm:$0xff]  }
  0x23   :  { %v3726_v60 = vrot.slane %v340_v49, %v3655_v46  ;;  %v343_v6 = vcombine.high %v340_v49, %v340_v49  ;;  %v808_v10 = vcombine.low %v3680_v62, %v805_v41  ;;  %v809_v63 = vcombine.high %v3680_v62, %v805_v41 }
  0x24   :  { %v283_v43 = vcombine.high %v260_v34, %v267_v35  ;;  %v282_v44 = vcombine.low %v260_v34, %v267_v35  ;;  %v285_v51 = vcombine.high %v274_v36, %v281_v42  ;;  %v284_v53 = vcombine.low %v274_v36, %v281_v42  ;;  %v3392_v34 = vld [vmem:[%s4308_s3 + $0xd0] sm:$0xff]  }
  0x25   :  { %v341_v59 = vcombine.low %v326_v47, %v333_v48  ;;  %v342_v5 = vcombine.high %v326_v47, %v333_v48  ;;  %v371_v14 = vrot.slane %v343_v6, %v3655_v46  ;;  %v823_v25 = vrot.slane %v808_v10, %v3655_v46  ;;  %v3395_v47 = vld [vmem:[%s4308_s3 + $0x58] sm:$0xff]  }
  0x26   :  { %v299_v52 = vrot.slane %v283_v43, %v3655_v46  ;;  %v292_v56 = vrot.slane %v282_v44, %v3655_v46  ;;  %v313_v7 = vrot.slane %v285_v51, %v3655_v46  ;;  %v306_v8 = vrot.slane %v284_v53, %v3655_v46  ;;  %v3394_v43 = vld [vmem:[%s4308_s3 + $0x90] sm:$0xff]   ;;  %v3397_v53 = vld [vmem:[%s4308_s3 + $0x18] sm:$0xff]  }
  0x27   :  { %v350_v11 = vrot.slane %v341_v59, %v3655_v46  ;;  %v357_v13 = vrot.slane %v342_v5, %v3655_v46  ;;  %v3755_v62 = vcombine.low %v3646_v39, %v789_v9  ;;  %v837_v31 = vrot.slane %v809_v63, %v3655_v46  ;;  %v3398_v6 = vld [vmem:[%s4308_s3 + $0x98] sm:$0xff]   ;;  %v3399_v9 = vld [vmem:[%s4308_s3 + $0x60] sm:$0xff]  }
  0x28   :  { %v316_v15 = vcombine.low %v299_v52, %v313_v7  ;;  %v314_v16 = vcombine.low %v292_v56, %v306_v8  ;;  %v315_v17 = vcombine.high %v292_v56, %v306_v8  ;;  %v995_v35 = vcombine.low %v816_v20, %v830_v22 }
  0x29   :  { %v373_v0 = vcombine.high %v350_v11, %v3726_v60  ;;  %v374_v24 = vcombine.low %v357_v13, %v371_v14  ;;  %v849_v33 = vrot.slane %v3755_v62, %v3655_v46  ;;  %v2840_v39 = vcombine.high %v816_v20, %v830_v22  ;;  %v3400_v13 = vld [vmem:[%s4308_s3 + $0xe0] sm:$0xff]  }
  0x2a   :  { %557 = vmatprep.mubr.bf16.mxu0 %v316_v15  ;;  %3150 = vmatprep.mubr.bf16.mxu1 %v315_v17  ;;  %v856_v36 = vrot.slane %v3761_v27, %v3655_v46  ;;  %v839_v38 = vcombine.high %v823_v25, %v823_v25  ;;  %v372_v42 = vcombine.low %v350_v11, %v3726_v60  ;;  %v3402_v22 = vld [vmem:[%s4308_s3 + $0xa0] sm:$0xff]  }
  0x2b   :  { %558 = vmatmul.mubr.bf16.vlgmr.msra.gmra.mrb[0].mxu0 %v314_v16  ;;  %3151 = vmatmul.mubr.bf16.vlgmr.msra.gmra.mrb[0].mxu1 %v373_v0  ;;  %v857_v40 = vcombine.low %v3684_v1, %v849_v33  ;;  %v858_v41 = vcombine.high %v3684_v1, %v849_v33  ;;  %v997_v49 = vcombine.low %v823_v25, %v837_v31  ;;  %v3405_v31 = vld [vmem:[%s4308_s3 + $0x28] sm:$0xff]  }
  0x2c   :  { %2962 = vmatpush3.bf16.msra.mxu0 %v3385_v61  ;;  %2990 = vmatpush3.bf16.msra.mxu1 %v3386_v12  ;;  %v859_v44 = vcombine.low %v3688_v2, %v856_v36  ;;  %v860_v45 = vcombine.high %v3688_v2, %v856_v36  ;;  %v3794_v51 = vrot.slane %v995_v35, %v3655_v46  ;;  %v3406_v36 = vld [vmem:[%s4308_s3 + $0xa8] sm:$0xff]  }
  0x2d   :  { %2963 = vmatprep.subr.bf16.mxu0 %v3387_v18  ;;  %2991 = vmatprep.subr.bf16.mxu1 %v3388_v19  ;;  %v867_v48 = vrot.slane %v857_v40, %v3655_v46  ;;  %v881_v1 = vrot.slane %v858_v41, %v3655_v46  ;;  %v3797_v2 = vrot.slane %v2840_v39, %v3655_v46  ;;  %v3401_v18 = vld [vmem:[%s4308_s3 + $0x20] sm:$0xff]   ;;  %v3408_v40 = vld [vmem:[%s4308_s3 + $0xf0] sm:$0xff]  }
  0x2e   :  { %565 = vmatprep.mubr.bf16.mxu0 %v374_v24  ;;  %v874_v52 = vrot.slane %v859_v44, %v3655_v46  ;;  %v888_v60 = vrot.slane %v860_v45, %v3655_v46  ;;  %v1019_v11 = vrot.slane %v997_v49, %v3655_v46  ;;  %v3403_v24 = vld [vmem:[%s4308_s3 + $0x68] sm:$0xff]  }
  0x2f   :  { %v906_v56 = vunpack.i.h.s16 %v867_v48  ;;  %v2833_v59 = vpack.i.b16 %v867_v48, %v839_v38  ;;  %v889_v5 = vcombine.high %v867_v48, %v867_v48  ;;  %v891_v7 = vcombine.high %v881_v1, %v881_v1  ;;  %v3410_v48 = vld [vmem:[%s4308_s3 + $0xb0] sm:$0xff]  }
  0x30   :  { %2964 = vmatpush3.bf16.msra.mxu0 %v3389_v23  ;;  %2992 = vmatpush3.bf16.msra.mxu1 %v3390_v26  ;;  %v908_v8 = vunpack.i.h.s16 %v881_v1  ;;  %v914_v61 = vunpack.i.h.s16 %v874_v52  ;;  %v1028_v14 = vcombine.high %v3794_v51, %v3797_v2  ;;  %v890_v15 = vcombine.high %v874_v52, %v874_v52  ;;  %v3404_v26 = vld [vmem:[%s4308_s3 + $0xe8] sm:$0xff]  }
  0x31   :  { %2965 = vmatprep.subr.bf16.mxu0 %v3391_v30  ;;  %2993 = vmatprep.subr.bf16.mxu1 %v3392_v34  ;;  %v2834_v10 = vpack.i.b16 %v881_v1, %v906_v56  ;;  %v910_v12 = vunpack.i.h.s16 %v889_v5  ;;  %v912_v16 = vunpack.i.h.s16 %v891_v7  ;;  %v916_v17 = vunpack.i.h.s16 %v888_v60  ;;  %v3414_v56 = vld [vmem:[%s4308_s3 + $0xb8] sm:$0xff]  }
  0x32   :  { %v2835_v0 = vpack.i.b16 %v889_v5, %v908_v8  ;;  %v2838_v20 = vpack.i.b16 %v888_v60, %v914_v61  ;;  %v1044_v34 = vrot.slane %v1028_v14, %v3655_v46  ;;  %v1027_v1 = vcombine.low %v3794_v51, %v3797_v2  ;;  %v3415_v5 = vld [vmem:[%s4310_s5 + $0x40] sm:$0xff]   ;;  %v3420_v14 = vld [vmem:[%s4310_s5 + $0xc8] sm:$0xff]  }
  0x33   :  { %566 = vmatmul.mubr.bf16.gmra.mrb[4].mxu0 %v372_v42  ;;  %v998_v63 = vcombine.low %v2833_v59, %v2834_v10  ;;  %v2836_v19 = vpack.i.b16 %v891_v7, %v910_v12  ;;  %v2837_v23 = vpack.i.b16 %v874_v52, %v912_v16  ;;  %v2839_v30 = vpack.i.b16 %v890_v15, %v916_v17  ;;  %v3409_v42 = vld [vmem:[%s4308_s3 + $0x30] sm:$0xff]   ;;  %v3412_v52 = vld [vmem:[%s4308_s3 + $0xf8] sm:$0xff]   ;;  %v3417_v7 = vld [vmem:[%s4310_s5] sm:$0xff]  }
  0x34   :  { %2966 = vmatpush3.bf16.msra.mxu0 %v3393_v37  ;;  %2994 = vmatpush3.bf16.msra.mxu1 %v3394_v43  ;;  %v3407_v37 = vld [vmem:[%s4308_s3 + $0x70] sm:$0xff]   ;;  %v1037_v59 = vrot.slane %v1027_v1, %v3655_v46  ;;  %v3421_v15 = vld [vmem:[%s4310_s5 + $0x8] sm:$0xff]  }
  0x35   :  { %2967 = vmatprep.subr.bf16.mxu0 %v3395_v47  ;;  %2995 = vmatprep.subr.bf16.mxu1 %v3396_v50  ;;  %v1026_v25 = vrot.slane %v998_v63, %v3655_v46  ;;  %v1063_v35 = vcombine.low %v2835_v0, %v2836_v19  ;;  %v1064_v39 = vcombine.low %v2837_v23, %v2838_v20  ;;  %v3411_v50 = vld [vmem:[%s4308_s3 + $0x78] sm:$0xff]   ;;  %v3423_v19 = vld [vmem:[%s4310_s5 + $0x50] sm:$0xff]  }
  0x36   :  { %v1085_v41 = vrot.slane %v2839_v30, %v3655_v46  ;;  %v3424_v20 = vld [vmem:[%s4310_s5 + $0xd0] sm:$0xff]   ;;  %v3484_v30 = vmov 1983009808  }
  0x37   :  { %v1030_v33 = vcombine.high %v1019_v11, %v1026_v25  ;;  %v1071_v45 = vrot.slane %v1063_v35, %v3655_v46  ;;  %v1078_v47 = vrot.slane %v1064_v39, %v3655_v46  ;;  %v1029_v49 = vcombine.low %v1019_v11, %v1026_v25  ;;  %v3418_v11 = vld [vmem:[%s4310_s5 + $0x80] sm:$0xff]   ;;  %v3426_v25 = vld [vmem:[%s4310_s5 + $0x90] sm:$0xff]   ;;  %v3429_v35 = vld [vmem:[%s4310_s5 + $0x18] sm:$0xff]  }
  0x38   :  { %2968 = vmatpush3.bf16.msra.mxu0 %v3397_v53  ;;  %2996 = vmatpush3.bf16.msra.mxu1 %v3398_v6  ;;  %v3413_v53 = vld [vmem:[%s4308_s3 + $0x38] sm:$0xff]   ;;  %v1088_v2 = vcombine.high %v1085_v41, %v1085_v41  ;;  %v3416_v6 = vld [vmem:[%s4310_s5 + $0xc0] sm:$0xff]   ;;  %v1109_v0 = vrot.slane %v1085_v41, %v3655_v46 }
  0x39   :  { %2969 = vmatprep.subr.bf16.mxu0 %v3399_v9  ;;  %2997 = vmatprep.subr.bf16.mxu1 %v3400_v13  ;;  %v1058_v38 = vrot.slane %v1030_v33, %v3655_v46  ;;  %v1087_v51 = vcombine.high %v1071_v45, %v1078_v47  ;;  %v1051_v60 = vrot.slane %v1029_v49, %v3655_v46  ;;  %v3419_v13 = vld [vmem:[%s4310_s5 + $0x48] sm:$0xff]   ;;  %v3428_v33 = vld [vmem:[%s4310_s5 + $0xd8] sm:$0xff]  }
  0x3a   :  { %v1116_v61 = vrot.slane %v1088_v2, %v3655_v46  ;;  %v1086_v12 = vcombine.low %v1071_v45, %v1078_v47 }
  0x3b   :  { %v1061_v43 = vcombine.low %v1044_v34, %v1058_v38  ;;  %v1062_v44 = vcombine.high %v1044_v34, %v1058_v38  ;;  %v1102_v8 = vrot.slane %v1087_v51, %v3655_v46  ;;  %v1059_v9 = vcombine.low %v1037_v59, %v1051_v60 }
  0x3c   :  { %2970 = vmatpush3.bf16.msra.mxu0 %v3401_v18  ;;  %2998 = vmatpush3.bf16.msra.mxu1 %v3402_v22  ;;  %v1060_v10 = vcombine.high %v1037_v59, %v1051_v60  ;;  %v3422_v18 = vld [vmem:[%s4310_s5 + $0x88] sm:$0xff]   ;;  %v1095_v63 = vrot.slane %v1086_v12, %v3655_v46  ;;  %v3425_v22 = vld [vmem:[%s4310_s5 + $0x10] sm:$0xff]   ;;  %v1800_v34 = vrot.slane %v3630_v28, 2  ;;  %v3432_v28 = vld [vmem:[%s4310_s5 + $0xe0] sm:$0xff]  }
  0x3d   :  { %2971 = vmatprep.subr.bf16.mxu0 %v3403_v24  ;;  %2999 = vmatprep.subr.bf16.mxu1 %v3404_v26  ;;  %v1119_v16 = vcombine.low %v1102_v8, %v1116_v61  ;;  %v1120_v17 = vcombine.high %v1102_v8, %v1116_v61  ;;  %v3427_v26 = vld [vmem:[%s4310_s5 + $0x58] sm:$0xff]  }
  0x3e   :  { %1353 = vmatprep.mubr.bf16.mxu0 %v1061_v43  ;;  %1402 = vmatprep.mubr.bf16.mxu1 %v1062_v44  ;;  %v1117_v23 = vcombine.low %v1095_v63, %v1109_v0  ;;  %v1118_v24 = vcombine.high %v1095_v63, %v1109_v0  ;;  %v1833_v41 = vcombine.high %v1800_v34, %v1800_v34 }
  0x40   :  { %2972 = vmatpush3.bf16.msra.mxu0 %v3405_v31  ;;  %3000 = vmatpush3.bf16.msra.mxu1 %v3406_v36  ;;  %v629_v31 = vunpack.c.l.s4 %v3484_v30  ;;  %v3430_v36 = vld [vmem:[%s4310_s5 + $0x98] sm:$0xff]  }
  0x41   :  { %2973 = vmatprep.subr.bf16.mxu0 %v3407_v37  ;;  %3001 = vmatprep.subr.bf16.mxu1 %v3408_v40  ;;  %v3431_v37 = vld [vmem:[%s4310_s5 + $0x60] sm:$0xff]   ;;  %v3931_v40 = vrot.slane %v3632_v29, 2 }
  0x42   :  { %v630_v39 = vunpack.c.0.s8 %v629_v31 }
  0x44   :  { %2974 = vmatpush3.bf16.msra.mxu0 %v3409_v42  ;;  %3002 = vmatpush3.bf16.msra.mxu1 %v3410_v48  ;;  %v3925_v38 = vsub.s32 %v630_v39, %v3635_v32 }
  0x45   :  { %2975 = vmatprep.subr.bf16.mxu0 %v3411_v50  ;;  %3003 = vmatprep.subr.bf16.mxu1 %v3412_v52 }
  0x46   :  { %v1808_v42 = vrot.slane %v3661_v54, %v3925_v38  ;;  %v1815_v43 = vrot.slane %v3664_v55, %v3925_v38  ;;  %v1855_v32 = vrot.slane %v3668_v57, %v3925_v38  ;;  %v1822_v44 = vrot.slane %v3690_v3, %v3925_v38 }
  0x47   :  { %v1829_v45 = vrot.slane %v3692_v4, %v3925_v38  ;;  %v1869_v29 = vrot.slane %v3755_v62, %v3925_v38 }
  0x48   :  { %2976 = vmatpush3.bf16.msra.mxu0 %v3413_v53  ;;  %3004 = vmatpush3.bf16.msra.mxu1 %v3414_v56 }
  0x49   :  { %3017 = vmatprep.subr.bf16.mxu0 %v3415_v5  ;;  %3045 = vmatprep.subr.bf16.mxu1 %v3416_v6 }
  0x4b   :  { %1354 = vmatmul.mubr.bf16.vlgmr.msra.gmra.mrb[8].mxu0 %v1059_v9  ;;  %1403 = vmatmul.mubr.bf16.vlgmr.msra.gmra.mrb[4].mxu1 %v1060_v10 }
  0x4c   :  { %3018 = vmatpush3.bf16.msra.mxu0 %v3417_v7  ;;  %3046 = vmatpush3.bf16.msra.mxu1 %v3418_v11 }
  0x4d   :  { %3019 = vmatprep.subr.bf16.mxu0 %v3419_v13  ;;  %3047 = vmatprep.subr.bf16.mxu1 %v3420_v14 }
  0x4e   :  { %1361 = vmatprep.mubr.bf16.mxu0 %v1119_v16  ;;  %1410 = vmatprep.mubr.bf16.mxu1 %v1120_v17 }
  0x50   :  { %3020 = vmatpush3.bf16.msra.mxu0 %v3421_v15  ;;  %3048 = vmatpush3.bf16.msra.mxu1 %v3422_v18 }
  0x51   :  { %3021 = vmatprep.subr.bf16.mxu0 %v3423_v19  ;;  %3049 = vmatprep.subr.bf16.mxu1 %v3424_v20 }
  0x53   :  { %1362 = vmatmul.mubr.bf16.gmra.mrb[12].mxu0 %v1117_v23  ;;  %1411 = vmatmul.mubr.bf16.gmra.mrb[8].mxu1 %v1118_v24 }
  0x54   :  { %3022 = vmatpush3.bf16.msra.mxu0 %v3425_v22  ;;  %3050 = vmatpush3.bf16.msra.mxu1 %v3426_v25 }
  0x55   :  { %3023 = vmatprep.subr.bf16.mxu0 %v3427_v26  ;;  %3051 = vmatprep.subr.bf16.mxu1 %v3428_v33 }
  0x56   :  { %16 = vsyncpa [#allocation3], 0  ;;  %v3433_v54 = vld [vmem:[%s4310_s5 + $0x20] sm:$0xff]   ;;  %v2877_v57 = vcombine.low %v1815_v43, %v1855_v32  ;;  %v1986_v3 = vrot.slane %v1808_v42, %v3925_v38  ;;  %v1862_v4 = vrot.slane %v3671_v58, %v3925_v38  ;;  %v3435_v62 = vld [vmem:[%s4310_s5 + $0x68] sm:$0xff]   ;;  %v2878_v48 = vcombine.low %v1829_v45, %v1869_v29  ;;  %s3488_s29 = smov [#allocation2]  }
  0x57   :  { %v3434_v55 = vld [vmem:[%s4310_s5 + $0xa0] sm:$0xff]   ;;  %v3436_v47 = vld [vmem:[%s4310_s5 + $0xe8] sm:$0xff]   ;;  %v1993_v1 = vrot.slane %v1822_v44, %v3925_v38  ;;  %v1876_v49 = vrot.slane %v3761_v27, %v3925_v38  ;;  %v1840_v58 = vrot.slane %v1800_v34, %v3925_v38  ;;  %v1847_v52 = vrot.slane %v1833_v41, %v3925_v38  ;;  %v3439_v5 = vld [vmem:[%s4310_s5 + $0x70] sm:$0xff]  }
  0x58   :  { %3024 = vmatpush3.bf16.msra.mxu0 %v3429_v35  ;;  %3052 = vmatpush3.bf16.msra.mxu1 %v3430_v36  ;;  %v2000_v50 = vrot.slane %v2877_v57, %v3925_v38  ;;  %v3968_v53 = vrot.slane %v3931_v40, %v3925_v38  ;;  %v2007_v51 = vrot.slane %v2878_v48, %v3925_v38  ;;  %v3437_v2 = vld [vmem:[%s4310_s5 + $0x28] sm:$0xff]   ;;  %v3440_v6 = vld [vmem:[%s4310_s5 + $0xf0] sm:$0xff]   ;;  %v3443_v15 = vld [vmem:[%s4310_s5 + $0x78] sm:$0xff]   ;;  %v3485_v45 = vmov 0.0|0.0  }
  0x59   :  { %3025 = vmatprep.subr.bf16.mxu0 %v3431_v37  ;;  %3053 = vmatprep.subr.bf16.mxu1 %v3432_v28  ;;  %v3438_v27 = vld [vmem:[%s4310_s5 + $0xa8] sm:$0xff]   ;;  %v1878_v59 = vcombine.high %v1855_v32, %v1869_v29  ;;  %v1848_v60 = vcombine.high %v1840_v58, %v1840_v58  ;;  %v1879_v8 = vcombine.low %v1862_v4, %v1876_v49  ;;  %v3441_v10 = vld [vmem:[%s4310_s5 + $0x30] sm:$0xff]   ;;  %v3444_v16 = vld [vmem:[%s4310_s5 + $0xf8] sm:$0xff]   ;;  %vm3486_vm0 = vmmov 0  }
  0x5a   :  { %v2009_v56 = vcombine.high %v1986_v3, %v2000_v50  ;;  %v2011_v7 = vcombine.high %v1993_v1, %v2007_v51  ;;  %v2013_v9 = vcombine.low %v1847_v52, %v3968_v53  ;;  %v3442_v11 = vld [vmem:[%s4310_s5 + $0xb0] sm:$0xff]   ;;  %v3445_v63 = vld [vmem:[%s4310_s5 + $0x38] sm:$0xff]   ;;  %v3447_v20 = vld [vmem:[%s4310_s5 + $0x100] sm:$0xff]   ;;  %v2008_v23 = vcombine.low %v1986_v3, %v2000_v50 }
  0x5b   :  { %v2012_v61 = vcombine.low %v1840_v58, %v1848_v60  ;;  %v2879_v12 = vcombine.low %v1878_v59, %v1862_v4  ;;  %v2880_v17 = vcombine.high %v1869_v29, %v1879_v8  ;;  %v3446_v0 = vld [vmem:[%s4310_s5 + $0xb8] sm:$0xff]   ;;  %v2010_v24 = vcombine.low %v1993_v1, %v2007_v51  ;;  %v3448_v26 = vld [vmem:[%s4310_s5 + $0x108] sm:$0xff]   ;;  %v3449_v31 = vld [vmem:[%s4310_s5 + $0x110] sm:$0xff]  }
  0x5c   :  { %3026 = vmatpush3.bf16.msra.mxu0 %v3433_v54  ;;  %3054 = vmatpush3.bf16.msra.mxu1 %v3434_v55  ;;  %v2027_v14 = vrot.slane %v2013_v9, %v3925_v38  ;;  %v3450_v33 = vld [vmem:[%s4310_s5 + $0x118] sm:$0xff]   ;;  %v3451_v34 = vld [vmem:[%s4310_s5 + $0x120] sm:$0xff]   ;;  %v3452_v35 = vld [vmem:[%s4310_s5 + $0x128] sm:$0xff]   ;;  %v1880_v39 = vcombine.high %v3931_v40, %v3931_v40  ;;  %v1895_v37 = vcombine.high %v3968_v53, %v3968_v53  ;;  %vm756_vm1 = vcmask 1045504  }
  0x5d   :  { %3027 = vmatprep.subr.bf16.mxu0 %v3435_v62  ;;  %3055 = vmatprep.subr.bf16.mxu1 %v3436_v47  ;;  %v2020_v13 = vrot.slane %v2012_v61, %v3925_v38  ;;  %v2037_v19 = vrot.slane %v2879_v12, %v3925_v38  ;;  %v2044_v22 = vrot.slane %v2880_v17, %v3925_v38  ;;  %v3453_v36 = vld [vmem:[%s4310_s5 + $0x130] sm:$0xff]   ;;  %v3454_v41 = vld [vmem:[%s4310_s5 + $0x138] sm:$0xff]   ;;  %v2488_v43 = vld [vmem:[%s4312_s7] sm:$0xff]  ;;  %vm1772_vm2 = vcmask 1044480  }
  0x5e   :  { %2337 = vmatprep.mubr.bf16.mxu0 %v2009_v56  ;;  %2385 = vmatprep.mubr.bf16.mxu1 %v2011_v7  ;;  %v1894_v28 = vrot.slane %v1880_v39, %v3925_v38  ;;  %v2489_v32 = vld [vmem:[%s4312_s7 + $0x8] sm:$0xff]  ;;  %v2490_v29 = vld [vmem:[%s4312_s7 + $0x10] sm:$0xff]  ;;  %v2491_v54 = vld [vmem:[%s4312_s7 + $0x18] sm:$0xff]  ;;  %vm2523_vm3 = vcmask 1041409   ;;  %vm2460_vm4 = vcmask 1043456   ;;  %vm2775_vm6 = vcmask 1041408  }
  0x5f   :  { %v2028_v18 = vcombine.low %v2020_v13, %v2027_v14  ;;  %v2045_v25 = vcombine.high %v2037_v19, %v2037_v19  ;;  %v2046_v30 = vcombine.high %v2044_v22, %v2044_v22  ;;  %v3304_v44 = vpack.c.bf16 %v2489_v32, %v2488_v43  ;;  %v2492_v57 = vld [vmem:[%s4312_s7 + $0x20] sm:$0xff]  ;;  %v2493_v3 = vld [vmem:[%s4312_s7 + $0x28] sm:$0xff]  ;;  %v2494_v62 = vld [vmem:[%s4312_s7 + $0x30] sm:$0xff] }
  0x60   :  { %3028 = vmatpush3.bf16.msra.mxu0 %v3437_v2  ;;  %3056 = vmatpush3.bf16.msra.mxu1 %v3438_v27  ;;  %v2047_v42 = vcombine.low %v1895_v37, %v1894_v28  ;;  %v3307_v55 = vpack.c.bf16 %v2491_v54, %v2490_v29  ;;  %v3310_v4 = vpack.c.bf16 %v2493_v3, %v2492_v57  ;;  %v2495_v47 = vld [vmem:[%s4312_s7 + $0x38] sm:$0xff]  ;;  %v2496_v1 = vld [vmem:[%s4312_s7 + $0x40] sm:$0xff]  ;;  %v2497_v49 = vld [vmem:[%s4312_s7 + $0x48] sm:$0xff] }
  0x61   :  { %3029 = vmatprep.subr.bf16.mxu0 %v3439_v5  ;;  %3057 = vmatprep.subr.bf16.mxu1 %v3440_v6  ;;  %v3313_v48 = vpack.c.bf16 %v2495_v47, %v2494_v62  ;;  %v3316_v50 = vpack.c.bf16 %v2497_v49, %v2496_v1  ;;  %v2498_v58 = vld [vmem:[%s4312_s7 + $0x50] sm:$0xff]  ;;  %v2499_v52 = vld [vmem:[%s4312_s7 + $0x58] sm:$0xff]  ;;  %v2500_v51 = vld [vmem:[%s4312_s7 + $0x60] sm:$0xff]  ;;  %v3487_v5 = vmov 0.0  }
  0x62   :  { %v2054_v40 = vrot.slane %v2047_v42, %v3925_v38  ;;  %v3319_v53 = vpack.c.bf16 %v2499_v52, %v2498_v58  ;;  %v2501_v2 = vld [vmem:[%s4312_s7 + $0x68] sm:$0xff]  ;;  %v2502_v56 = vld [vmem:[%s4312_s7 + $0x70] sm:$0xff]  ;;  %v2503_v59 = vld [vmem:[%s4312_s7 + $0x78] sm:$0xff] }
  0x63   :  { %v3322_v27 = vpack.c.bf16 %v2501_v2, %v2500_v51  ;;  %v3325_v60 = vpack.c.bf16 %v2503_v59, %v2502_v56  ;;  %v2504_v6 = vld [vmem:[%s4313_s8] sm:$0xff]  ;;  %v2505_v7 = vld [vmem:[%s4313_s8 + $0x8] sm:$0xff]  ;;  %v2506_v61 = vld [vmem:[%s4313_s8 + $0x10] sm:$0xff] }
  0x64   :  { %3030 = vmatpush3.bf16.msra.mxu0 %v3441_v10  ;;  %3058 = vmatpush3.bf16.msra.mxu1 %v3442_v11  ;;  %v3280_v8 = vpack.c.bf16 %v2505_v7, %v2504_v6  ;;  %v2507_v9 = vld [vmem:[%s4313_s8 + $0x18] sm:$0xff]  ;;  %v2508_v11 = vld [vmem:[%s4313_s8 + $0x20] sm:$0xff]  ;;  %v2509_v12 = vld [vmem:[%s4313_s8 + $0x28] sm:$0xff] }
  0x65   :  { %3031 = vmatprep.subr.bf16.mxu0 %v3443_v15  ;;  %3059 = vmatprep.subr.bf16.mxu1 %v3444_v16  ;;  %v3283_v10 = vpack.c.bf16 %v2507_v9, %v2506_v61  ;;  %v3286_v13 = vpack.c.bf16 %v2509_v12, %v2508_v11  ;;  %v2510_v14 = vld [vmem:[%s4313_s8 + $0x30] sm:$0xff]  ;;  %v2511_v15 = vld [vmem:[%s4313_s8 + $0x38] sm:$0xff]  ;;  %v2512_v17 = vld [vmem:[%s4313_s8 + $0x40] sm:$0xff] }
  0x66   :  { %v3289_v16 = vpack.c.bf16 %v2511_v15, %v2510_v14 }
  0x68   :  { %3032 = vmatpush3.bf16.msra.mxu0 %v3445_v63  ;;  %3060 = vmatpush3.bf16.msra.mxu1 %v3446_v0  ;;  %v2514_v0 = vld [vmem:[%s4313_s8 + $0x50] sm:$0xff] }
  0x69   :  { %3154 = vmatprep.subr.bf16.mxu0 %v3447_v20  ;;  %3279 = vmatprep.subr.bf16.mxu1 %v3485_v45 }
  0x6b   :  { %2338 = vmatmul.mubr.bf16.vlgmr.msra.gmra.mrb[16].mxu0 %v2008_v23  ;;  %2386 = vmatmul.mubr.bf16.vlgmr.msra.gmra.mrb[12].mxu1 %v2010_v24  ;;  %v2517_v23 = vld [vmem:[%s4313_s8 + $0x68] sm:$0xff] }
  0x6c   :  { %3155 = vmatpush3.bf16.msra.mxu0 %v3447_v20  ;;  %2345 = vmatprep.mubr.bf16.mxu0 %v2045_v25  ;;  %v2518_v25 = vld [vmem:[%s4313_s8 + $0x70] sm:$0xff] }
  0x6d   :  { %3156 = vmatprep.subr.bf16.mxu0 %v3448_v26  ;;  %2393 = vmatprep.mubr.bf16.mxu1 %v2046_v30 }
  0x6e   :  { %3281 = vmatpush3.bf16.msra.mxu1 %v3280_v8 }
  0x6f   :  { %3282 = vmatprep.subr.bf16.mxu1 %v3485_v45 }
  0x70   :  { %3157 = vmatpush3.bf16.msra.mxu0 %v3448_v26  ;;  %v2519_v26 = vld [vmem:[%s4313_s8 + $0x78] sm:$0xff] }
  0x71   :  { %3158 = vmatprep.subr.bf16.mxu0 %v3449_v31  ;;  %v3301_v30 = vpack.c.bf16 %v2519_v26, %v2518_v25 }
  0x72   :  { %3284 = vmatpush3.bf16.msra.mxu1 %v3283_v10 }
  0x73   :  { %2346 = vmatmul.mubr.bf16.gmra.mrb[20].mxu0 %v2037_v19  ;;  %2394 = vmatmul.mubr.bf16.gmra.mrb[16].mxu1 %v2044_v22  ;;  %v2515_v19 = vld [vmem:[%s4313_s8 + $0x58] sm:$0xff]  ;;  %v2516_v22 = vld [vmem:[%s4313_s8 + $0x60] sm:$0xff] }
  0x74   :  { %3159 = vmatpush3.bf16.msra.mxu0 %v3449_v31  ;;  %3170 = vmatprep.mubr.bf16.mxu0 %v2028_v18  ;;  %v2513_v18 = vld [vmem:[%s4313_s8 + $0x48] sm:$0xff]  ;;  %v3295_v20 = vpack.c.bf16 %v2515_v19, %v2514_v0  ;;  %v3298_v24 = vpack.c.bf16 %v2517_v23, %v2516_v22 }
  0x75   :  { %3160 = vmatprep.subr.bf16.mxu0 %v3450_v33  ;;  %3206 = vmatprep.mubr.msk.f32.mxu1 %vm3486_vm0, %v3487_v5  ;;  %v3292_v63 = vpack.c.bf16 %v2513_v18, %v2512_v17 }
  0x76   :  { %3285 = vmatprep.subr.bf16.mxu1 %v3485_v45 }
  0x77   :  { %3287 = vmatpush3.bf16.msra.mxu1 %v3286_v13 }
  0x78   :  { %3161 = vmatpush3.bf16.msra.mxu0 %v3450_v33  ;;  %3288 = vmatprep.subr.bf16.mxu1 %v3485_v45 }
  0x79   :  { %3162 = vmatprep.subr.bf16.mxu0 %v3451_v34 }
  0x7b   :  { %3290 = vmatpush3.bf16.msra.mxu1 %v3289_v16 }
  0x7c   :  { %3163 = vmatpush3.bf16.msra.mxu0 %v3451_v34  ;;  %3291 = vmatprep.subr.bf16.mxu1 %v3485_v45 }
  0x7d   :  { %3164 = vmatprep.subr.bf16.mxu0 %v3452_v35 }
  0x7f   :  { %3293 = vmatpush3.bf16.msra.mxu1 %v3292_v63 }
  0x80   :  { %3165 = vmatpush3.bf16.msra.mxu0 %v3452_v35  ;;  %3294 = vmatprep.subr.bf16.mxu1 %v3485_v45 }
  0x81   :  { %3166 = vmatprep.subr.bf16.mxu0 %v3453_v36 }
  0x83   :  { %3296 = vmatpush3.bf16.msra.mxu1 %v3295_v20 }
  0x84   :  { %3167 = vmatpush3.bf16.msra.mxu0 %v3453_v36  ;;  %3297 = vmatprep.subr.bf16.mxu1 %v3485_v45 }
  0x85   :  { %3168 = vmatprep.subr.bf16.mxu0 %v3454_v41 }
  0x87   :  { %3299 = vmatpush3.bf16.msra.mxu1 %v3298_v24 }
  0x88   :  { %3169 = vmatpush3.bf16.msra.mxu0 %v3454_v41  ;;  %3300 = vmatprep.subr.bf16.mxu1 %v3485_v45 }
  0x89   :  { %3303 = vmatprep.subr.bf16.mxu0 %v3485_v45 }
  0x8b   :  { %3171 = vmatmul.mubr.bf16.vlgmr.msra.gmra.mrb[24].mxu0 %v2054_v40  ;;  %3302 = vmatpush3.bf16.msra.mxu1 %v3301_v30 }
  0x8c   :  { %3305 = vmatpush3.bf16.msra.mxu0 %v3304_v44  ;;  %3241 = vmatprep.mubr.msk.f32.mxu0 %vm3486_vm0, %v3487_v5 }
  0x8d   :  { %3306 = vmatprep.subr.bf16.mxu0 %v3485_v45  ;;  %3327 = vmatprep.subr.bf16.mxu1 %v3485_v45 }
  0x90   :  { %3308 = vmatpush3.bf16.msra.mxu0 %v3307_v55 }
  0x91   :  { %3309 = vmatprep.subr.bf16.mxu0 %v3485_v45 }
  0x94   :  { %3311 = vmatpush3.bf16.msra.mxu0 %v3310_v4 }
  0x95   :  { %3312 = vmatprep.subr.bf16.mxu0 %v3485_v45 }
  0x98   :  { %3314 = vmatpush3.bf16.msra.mxu0 %v3313_v48 }
  0x99   :  { %3315 = vmatprep.subr.bf16.mxu0 %v3485_v45 }
  0x9c   :  { %3317 = vmatpush3.bf16.msra.mxu0 %v3316_v50 }
  0x9d   :  { %3318 = vmatprep.subr.bf16.mxu0 %v3485_v45 }
  0xa0   :  { %3320 = vmatpush3.bf16.msra.mxu0 %v3319_v53 }
  0xa1   :  { %3321 = vmatprep.subr.bf16.mxu0 %v3485_v45 }
  0xa4   :  { %3323 = vmatpush3.bf16.msra.mxu0 %v3322_v27 }
  0xa5   :  { %3324 = vmatprep.subr.bf16.mxu0 %v3485_v45 }
  0xa8   :  { %3326 = vmatpush3.bf16.msra.mxu0 %v3325_v60 }
  0xfe   :  { %v2939_v31 = vpop.f32.mrb[0].mxu0  ;;  %v3152_v33 = vpop.f32.mrb[0].mxu1 }
  0xff   :  { %v2940_v34 = vpop.f32.mrb[1].mxu0  ;;  %v608_v35 = vpop.f32.mrb[1].mxu1 }
 0x100   :  { %v2941_v39 = vadd.f32 %v2940_v34, %v2939_v31  ;;  %v2942_v36 = vpop.f32.mrb[2].mxu0  ;;  %v3153_v37 = vpop.f32.mrb[2].mxu1 }
 0x101   :  { %v2943_v28 = vpop.f32.mrb[3].mxu0  ;;  %v611_v41 = vpop.f32.mrb[3].mxu1 }
 0x102   :  { %v2944_v42 = vadd.f32 %v2943_v28, %v2942_v36  ;;  %v609_v40 = vadd.f32 %v2941_v39, %v608_v35 }
 0x104   :  { %v627_v43 = vcombine.high %v609_v40, %v609_v40  ;;  %v634_v32 = vrot.slane %v609_v40, %v3925_v38  ;;  %v612_v44 = vadd.f32 %v2944_v42, %v611_v41 }
 0x106   :  { %v641_v29 = vrot.slane %v627_v43, %v3925_v38  ;;  %v642_v54 = vcombine.high %v634_v32, %v634_v32  ;;  %v644_v55 = vcombine.high %v612_v44, %v612_v44  ;;  %v651_v57 = vrot.slane %v612_v44, %v3925_v38  ;;  %v2945_v3 = vpop.f32.mrb[4].mxu0 }
 0x107   :  { %v2946_v4 = vpop.f32.mrb[5].mxu0 }
 0x108   :  { %v643_v62 = vcombine.high %v641_v29, %v641_v29  ;;  %v686_v47 = vcombine.low %v634_v32, %v642_v54  ;;  %v658_v48 = vrot.slane %v644_v55, %v3925_v38  ;;  %v659_v1 = vcombine.high %v651_v57, %v651_v57  ;;  %v2948_v49 = vpop.f32.mrb[6].mxu0 }
 0x109   :  { %v2947_v50 = vadd.f32 %v2946_v4, %v2945_v3  ;;  %v2949_v58 = vpop.f32.mrb[7].mxu0 }
 0x10a   :  { %v687_v52 = vcombine.low %v641_v29, %v643_v62  ;;  %v703_v53 = vcombine.low %v651_v57, %v659_v1  ;;  %v2950_v2 = vadd.f32 %v2949_v58, %v2948_v49  ;;  %v694_v27 = vrot.slane %v686_v47, %v3925_v38  ;;  %v2832_v58 = vld [vmem:[%s4307_s2] ss:$0 sm:$0xff] }
 0x10b   :  { %v617_v51 = vadd.f32 %v3152_v33, %v2947_v50  ;;  %v717_v60 = vrot.slane %v658_v48, %v3925_v38  ;;  %v660_v6 = vcombine.high %v658_v48, %v658_v48 }
 0x10c   :  { %v701_v56 = vrot.slane %v687_v52, %v3925_v38  ;;  %v710_v59 = vrot.slane %v703_v53, %v3925_v38  ;;  %v620_v61 = vadd.f32 %v3153_v37, %v2950_v2 }
 0x10d   :  { %v661_v7 = vcombine.high %v617_v51, %v617_v51  ;;  %v668_v8 = vrot.slane %v617_v51, %v3925_v38 }
 0x10e   :  { %v702_v9 = vcombine.low %v694_v27, %v701_v56  ;;  %v718_v10 = vcombine.low %v710_v59, %v717_v60  ;;  %v684_v14 = vrot.slane %v620_v61, %v3925_v38 }
 0x10f   :  { %v675_v11 = vrot.slane %v661_v7, %v3925_v38  ;;  %v676_v12 = vcombine.high %v668_v8, %v668_v8  ;;  %v719_v13 = vcombine.low %v660_v6, %v668_v8 }
 0x110   :  { %v757_v15 = vsel %vm756_vm1, %v718_v10, -inf  ;;  %v685_v63 = vcombine.high %v684_v14, %v684_v14 }
 0x111   :  { %v758_v16 = vmax.f32 %v702_v9, %v757_v15  ;;  %v720_v17 = vcombine.low %v676_v12, %v675_v11  ;;  %v677_v18 = vcombine.high %v675_v11, %v675_v11  ;;  %v727_v19 = vrot.slane %v719_v13, %v3925_v38 }
 0x112   :  { %v750_v26 = vrot.slane %v685_v63, %v3925_v38 }
 0x113   :  { %v759_v0 = vrot.slane %v758_v16, 4  ;;  %v734_v20 = vrot.slane %v720_v17, %v3925_v38  ;;  %v736_v22 = vcombine.low %v677_v18, %v684_v14 }
 0x115   :  { %v760_v23 = vmax.f32 %v758_v16, %v759_v0  ;;  %v735_v24 = vcombine.low %v727_v19, %v734_v20  ;;  %v743_v25 = vrot.slane %v736_v22, %v3925_v38 }
 0x117   :  { %v751_v30 = vcombine.low %v743_v25, %v750_v26  ;;  %v761_v31 = vrot.slane %v760_v23, 2 }
 0x119   :  { %v765_v33 = vsel %vm756_vm1, %v751_v30, -inf  ;;  %v762_v35 = vmax.f32 %v760_v23, %v761_v31 }
 0x11a   :  { %v766_v34 = vmax.f32 %v735_v24, %v765_v33 }
 0x11b   :  { %v763_v40 = vrot.slane %v762_v35, 1 }
 0x11c   :  { %v767_v39 = vrot.slane %v766_v34, 4 }
 0x11d   :  { %v764_v47 = vmax.f32 %v762_v35, %v763_v40 }
 0x11e   :  { %v2977_v36 = vpop.f32.mrb[8].mxu0  ;;  %v3005_v37 = vpop.f32.mrb[4].mxu1  ;;  %v768_v28 = vmax.f32 %v766_v34, %v767_v39 }
 0x11f   :  { %v2978_v41 = vpop.f32.mrb[9].mxu0  ;;  %v3006_v42 = vpop.f32.mrb[5].mxu1  ;;  %v4177_v8 = vadd.f32 %v2832_v58, %v764_v47 }
 0x120   :  { %v2979_v43 = vadd.f32 %v2978_v41, %v2977_v36  ;;  %v3007_v32 = vadd.f32 %v3006_v42, %v3005_v37  ;;  %v2980_v44 = vpop.f32.mrb[10].mxu0  ;;  %v3008_v29 = vpop.f32.mrb[6].mxu1  ;;  %v769_v54 = vrot.slane %v768_v28, 2 }
 0x121   :  { %v2981_v55 = vpop.f32.mrb[11].mxu0  ;;  %v3009_v38 = vpop.f32.mrb[7].mxu1 }
 0x122   :  { %v1405_v57 = vadd.f32 %v3007_v32, %v2979_v43  ;;  %v2982_v3 = vadd.f32 %v2981_v55, %v2980_v44  ;;  %v3010_v4 = vadd.f32 %v3009_v38, %v3008_v29  ;;  %v770_v62 = vmax.f32 %v768_v28, %v769_v54 }
 0x123   :  { %v782_v29 = vmax.f32 %v4177_v8, 0.0 }
 0x124   :  { %v1423_v48 = vcombine.high %v1405_v57, %v1405_v57  ;;  %v1430_v1 = vrot.slane %v1405_v57, %v3655_v46  ;;  %v1408_v49 = vadd.f32 %v3010_v4, %v2982_v3  ;;  %v771_v50 = vrot.slane %v770_v62, 1 }
 0x126   :  { %v1437_v52 = vrot.slane %v1423_v48, %v3655_v46  ;;  %v1438_v53 = vcombine.high %v1430_v1, %v1430_v1  ;;  %v1472_v51 = vcombine.high %v1408_v49, %v1408_v49  ;;  %v2983_v2 = vpop.f32.mrb[12].mxu0  ;;  %v3011_v27 = vpop.f32.mrb[8].mxu1  ;;  %v1446_v56 = vrot.slane %v1430_v1, %v3655_v46 }
 0x127   :  { %v1479_v59 = vrot.slane %v1408_v49, %v3655_v46  ;;  %v2984_v60 = vpop.f32.mrb[13].mxu0  ;;  %v3012_v6 = vpop.f32.mrb[9].mxu1  ;;  %v772_v7 = vmax.f32 %v770_v62, %v771_v50 }
 0x128   :  { %v1439_v61 = vcombine.high %v1437_v52, %v1437_v52  ;;  %v1453_v9 = vrot.slane %v1437_v52, %v3655_v46  ;;  %v1460_v10 = vrot.slane %v1438_v53, %v3655_v46  ;;  %v1486_v11 = vrot.slane %v1472_v51, %v3655_v46  ;;  %v2986_v12 = vpop.f32.mrb[14].mxu0  ;;  %v3014_v13 = vpop.f32.mrb[10].mxu1 }
 0x129   :  { %v1487_v14 = vcombine.high %v1479_v59, %v1479_v59  ;;  %v1495_v15 = vrot.slane %v1479_v59, %v3655_v46  ;;  %v2985_v16 = vadd.f32 %v2984_v60, %v2983_v2  ;;  %v3013_v17 = vadd.f32 %v3012_v6, %v3011_v27  ;;  %v2987_v18 = vpop.f32.mrb[15].mxu0  ;;  %v3015_v63 = vpop.f32.mrb[11].mxu1 }
 0x12a   :  { %v1467_v0 = vrot.slane %v1439_v61, %v3655_v46  ;;  %v1592_v19 = vcombine.low %v1446_v56, %v1460_v10  ;;  %v2873_v20 = vcombine.high %v1446_v56, %v1460_v10  ;;  %v1488_v22 = vcombine.high %v1486_v11, %v1486_v11 }
 0x12b   :  { %v1502_v23 = vrot.slane %v1486_v11, %v3655_v46  ;;  %v1509_v24 = vrot.slane %v1487_v14, %v3655_v46  ;;  %v1413_v25 = vadd.f32 %v3013_v17, %v2985_v16  ;;  %v2988_v26 = vadd.f32 %v2987_v18, %v2986_v12 }
 0x12c   :  { %v1594_v30 = vcombine.low %v1453_v9, %v1467_v0  ;;  %v2874_v31 = vcombine.high %v1453_v9, %v1467_v0  ;;  %v1602_v33 = vrot.slane %v1592_v19, %v3655_v46  ;;  %v1609_v34 = vrot.slane %v2873_v20, %v3655_v46 }
 0x12d   :  { %v1516_v35 = vrot.slane %v1488_v22, %v3655_v46  ;;  %v1518_v39 = vcombine.high %v1502_v23, %v1502_v23  ;;  %v1641_v36 = vcombine.low %v1495_v15, %v1509_v24  ;;  %v2875_v37 = vcombine.high %v1495_v15, %v1509_v24 }
 0x12e   :  { %v1616_v28 = vrot.slane %v1594_v30, %v3655_v46  ;;  %v1623_v41 = vrot.slane %v2874_v31, %v3655_v46  ;;  %v1624_v42 = vcombine.low %v1602_v33, %v1609_v34  ;;  %v1663_v40 = vrot.slane %v1502_v23, %v3655_v46 }
 0x12f   :  { %v1649_v43 = vrot.slane %v1641_v36, %v3655_v46  ;;  %v1656_v32 = vrot.slane %v2875_v37, %v3655_v46  ;;  %v1680_v44 = vcombine.low %v1516_v35, %v1518_v39  ;;  %v1520_v38 = vcombine.high %v1516_v35, %v1516_v35 }
 0x130   :  { %v1625_v54 = vcombine.low %v1616_v28, %v1623_v41  ;;  %v1632_v55 = vrot.slane %v1624_v42, %v3655_v46  ;;  %v1521_v57 = vcombine.high %v1413_v25, %v1413_v25  ;;  %v1678_v4 = vrot.slane %v1663_v40, %v3655_v46 }
 0x131   :  { %v1664_v3 = vcombine.low %v1649_v43, %v1656_v32  ;;  %v1528_v62 = vrot.slane %v1413_v25, %v3655_v46  ;;  %v3016_v47 = vadd.f32 %v3015_v63, %v3014_v13  ;;  %v1690_v49 = vrot.slane %v1680_v44, %v3655_v46 }
 0x132   :  { %v1639_v48 = vrot.slane %v1625_v54, %v3655_v46  ;;  %v1535_v1 = vrot.slane %v1521_v57, %v3655_v46  ;;  %v781_v50 = vadd.f32 %v2832_v58, %v772_v7 }
 0x133   :  { %v1671_v52 = vrot.slane %v1664_v3, %v3655_v46  ;;  %v1536_v53 = vcombine.high %v1528_v62, %v1528_v62  ;;  %v1544_v51 = vrot.slane %v1528_v62, %v3655_v46  ;;  %v1416_v2 = vadd.f32 %v3016_v47, %v2988_v26 }
 0x134   :  { %v1640_v27 = vcombine.low %v1632_v55, %v1639_v48  ;;  %v1537_v56 = vcombine.high %v1535_v1, %v1535_v1  ;;  %v1551_v59 = vrot.slane %v1535_v1, %v3655_v46  ;;  %v783_v60 = vmax.f32 %v781_v50, 0.0 }
 0x135   :  { %v1679_v6 = vcombine.low %v1671_v52, %v1678_v4  ;;  %v1558_v8 = vrot.slane %v1536_v53, %v3655_v46  ;;  %v1566_v61 = vcombine.high %v1544_v51, %v1544_v51  ;;  %v1681_v9 = vcombine.low %v1520_v38, %v1544_v51 }
 0x136   :  { %v1565_v10 = vrot.slane %v1537_v56, %v3655_v46  ;;  %v1567_v11 = vcombine.high %v1551_v59, %v1551_v59  ;;  %v1576_v58 = vrot.slane %v1416_v2, %v3655_v46  ;;  %v2598_v7 = vrot.slane %v783_v60, 7 }
 0x137   :  { %v1773_v12 = vsel %vm1772_vm2, %v1679_v6, -inf  ;;  %v1568_v13 = vcombine.high %v1558_v8, %v1558_v8  ;;  %v1682_v14 = vcombine.low %v1558_v8, %v1566_v61  ;;  %v1697_v15 = vrot.slane %v1681_v9, %v3655_v46 }
 0x138   :  { %v1774_v16 = vmax.f32 %v1640_v27, %v1773_v12  ;;  %v1729_v17 = vcombine.low %v1565_v10, %v1567_v11  ;;  %v1569_v18 = vcombine.high %v1565_v10, %v1565_v10  ;;  %v1577_v63 = vcombine.high %v1576_v58, %v1576_v58 }
 0x139   :  { %v1683_v0 = vcombine.low %v1568_v13, %v1551_v59  ;;  %v1704_v19 = vrot.slane %v1682_v14, %v3655_v46  ;;  %v1712_v20 = vcombine.low %v1690_v49, %v1697_v15  ;;  %v1584_v22 = vrot.slane %v1576_v58, %v3655_v46 }
 0x13a   :  { %v1591_v23 = vrot.slane %v1577_v63, %v3655_v46  ;;  %v2599_v24 = vsel %vm2523_vm3, %v2598_v7, %v782_v29  ;;  %v1737_v30 = vrot.slane %v1729_v17, %v3655_v46  ;;  %v1775_v33 = vrot.slane %v1774_v16, 4 }
 0x13b   :  { %v1711_v25 = vrot.slane %v1683_v0, %v3655_v46  ;;  %v1730_v26 = vcombine.low %v1569_v18, %v1584_v22  ;;  %3242 = vmatmul.mubr.f32.vlgmr.msra.gmra.mrb[28].mxu0 %v2599_v24  ;;  %v1720_v37 = vrot.slane %v1712_v20, %v3655_v46  ;;  %v2671_v0 = vld [vmem:[%s4314_s9] sm:$0xff] }
 0x13c   :  { %v1751_v31 = vrot.slane %v1591_v23, %v3655_v46  ;;  %v1776_v55 = vmax.f32 %v1774_v16, %v1775_v33  ;;  %v2876_v16 = vld [vmem:[%s4309_s4] ss:$0 sm:$0xff] }
 0x13d   :  { %v1713_v34 = vcombine.low %v1704_v19, %v1711_v25  ;;  %v1744_v35 = vrot.slane %v1730_v26, %v3655_v46  ;;  %v2672_v19 = vld [vmem:[%s4314_s9 + $0x8] sm:$0xff]  ;;  %v2673_v25 = vld [vmem:[%s4314_s9 + $0x10] sm:$0xff]  ;;  %v2674_v26 = vld [vmem:[%s4314_s9 + $0x18] sm:$0xff] }
 0x13e   :  { %v3033_v39 = vpop.f32.mrb[16].mxu0  ;;  %v3061_v36 = vpop.f32.mrb[12].mxu1  ;;  %v1766_v42 = vrot.slane %v1751_v31, %v3655_v46  ;;  %v1777_v49 = vrot.slane %v1776_v55, 2  ;;  %v3328_v24 = vpack.c.bf16 %v2672_v19, %v2671_v0  ;;  %v3331_v31 = vpack.c.bf16 %v2674_v26, %v2673_v25  ;;  %v2675_v33 = vld [vmem:[%s4314_s9 + $0x20] sm:$0xff] }
 0x13f   :  { %v1727_v28 = vrot.slane %v1713_v34, %v3655_v46  ;;  %v1752_v41 = vcombine.low %v1737_v30, %v1744_v35  ;;  %v3034_v40 = vpop.f32.mrb[17].mxu0  ;;  %v3062_v43 = vpop.f32.mrb[13].mxu1  ;;  %v2676_v34 = vld [vmem:[%s4314_s9 + $0x28] sm:$0xff]  ;;  %v2772_v25 = vand.u32 127, %v76_v21 }
 0x140   :  { %v3035_v32 = vadd.f32 %v3034_v40, %v3033_v39  ;;  %v3063_v44 = vadd.f32 %v3062_v43, %v3061_v36  ;;  %v3036_v29 = vpop.f32.mrb[18].mxu0  ;;  %v3064_v54 = vpop.f32.mrb[14].mxu1  ;;  %v1778_v8 = vmax.f32 %v1776_v55, %v1777_v49  ;;  %v2678_v40 = vld [vmem:[%s4314_s9 + $0x38] sm:$0xff] }
 0x141   :  { %v1728_v38 = vcombine.low %v1720_v37, %v1727_v28  ;;  %v1759_v57 = vrot.slane %v1752_v41, %v3655_v46  ;;  %v3037_v3 = vpop.f32.mrb[19].mxu0  ;;  %v3065_v4 = vpop.f32.mrb[15].mxu1  ;;  %v3334_v41 = vpack.c.bf16 %v2676_v34, %v2675_v33  ;;  %vm2773_vm5 = vcmp.lt.s32.totalorder %v2772_v25, 4 }
 0x142   :  { %v3038_v62 = vadd.f32 %v3037_v3, %v3036_v29  ;;  %v3066_v47 = vadd.f32 %v3065_v4, %v3064_v54  ;;  %v2388_v48 = vadd.f32 %v3063_v44, %v3035_v32  ;;  %v1779_v7 = vrot.slane %v1778_v8, 1  ;;  %v2680_v3 = vld [vmem:[%s4314_s9 + $0x48] sm:$0xff] }
 0x143   :  { %v1767_v1 = vcombine.low %v1759_v57, %v1766_v42  ;;  %v2679_v57 = vld [vmem:[%s4314_s9 + $0x40] sm:$0xff] }
 0x144   :  { %v2391_v50 = vadd.f32 %v3066_v47, %v3038_v62  ;;  %v1780_v14 = vmax.f32 %v1778_v8, %v1779_v7  ;;  %v3340_v49 = vpack.c.bf16 %v2680_v3, %v2679_v57 }
 0x145   :  { %v1781_v52 = vsel %vm1772_vm2, %v1767_v1, -inf }
 0x146   :  { %v1782_v53 = vmax.f32 %v1728_v38, %v1781_v52  ;;  %v3039_v51 = vpop.f32.mrb[20].mxu0  ;;  %v3067_v2 = vpop.f32.mrb[16].mxu1  ;;  %v1796_v18 = vadd.f32 %v2876_v16, %v1780_v14  ;;  %v2682_v52 = vld [vmem:[%s4314_s9 + $0x58] sm:$0xff] }
 0x147   :  { %v3040_v27 = vpop.f32.mrb[21].mxu0  ;;  %v3068_v56 = vpop.f32.mrb[17].mxu1 }
 0x148   :  { %v3041_v59 = vadd.f32 %v3040_v27, %v3039_v51  ;;  %v3042_v60 = vpop.f32.mrb[22].mxu0  ;;  %v3069_v6 = vadd.f32 %v3068_v56, %v3067_v2  ;;  %v1783_v46 = vrot.slane %v1782_v53, 4  ;;  %v3070_v61 = vpop.f32.mrb[18].mxu1  ;;  %v1798_v22 = vmax.f32 %v1796_v18, 0.0 }
 0x149   :  { %v3043_v9 = vpop.f32.mrb[23].mxu0  ;;  %v3071_v10 = vpop.f32.mrb[19].mxu1  ;;  %v2684_v60 = vld [vmem:[%s4314_s9 + $0x68] sm:$0xff] }
 0x14a   :  { %v1784_v11 = vmax.f32 %v1782_v53, %v1783_v46  ;;  %v2396_v58 = vadd.f32 %v3069_v6, %v3041_v59  ;;  %v2683_v59 = vld [vmem:[%s4314_s9 + $0x60] sm:$0xff]  ;;  %v2685_v10 = vld [vmem:[%s4314_s9 + $0x70] sm:$0xff] }
 0x14b   :  { %v3346_v9 = vpack.c.bf16 %v2684_v60, %v2683_v59 }
 0x14c   :  { %v1785_v12 = vrot.slane %v1784_v11, 2 }
 0x14e   :  { %v1786_v13 = vmax.f32 %v1784_v11, %v1785_v12  ;;  %v2686_v11 = vld [vmem:[%s4314_s9 + $0x78] sm:$0xff]  ;;  %v2921_v12 = vld [vmem:[%s4311_s6] ss:$0 sm:$0xff] }
 0x150   :  { %v1787_v15 = vrot.slane %v1786_v13, 1 }
 0x152   :  { %v1788_v17 = vmax.f32 %v1786_v13, %v1787_v15  ;;  %v3349_v13 = vpack.c.bf16 %v2686_v11, %v2685_v10 }
 0x154   :  { %v1797_v63 = vadd.f32 %v2876_v16, %v1788_v17 }
 0x156   :  { %v1799_v20 = vmax.f32 %v1797_v63, 0.0 }
 0x158   :  { %v2522_v23 = vrot.slane %v1799_v20, 7 }
 0x15a   :  { %v2524_v30 = vsel %vm2523_vm3, %v2522_v23, %v1798_v22 }
 0x15b   :  { %3207 = vmatmul.mubr.f32.vlgmr.msra.gmra.mrb[20].mxu1 %v2524_v30 }
 0x15c   :  { %3329 = vmatpush3.bf16.msra.mxu1 %v3328_v24  ;;  %3276 = vmatprep.mubr.msk.f32.mxu1 %vm3486_vm0, %v3487_v5  ;;  %v2677_v5 = vld [vmem:[%s4314_s9 + $0x30] sm:$0xff] }
 0x15d   :  { %3330 = vmatprep.subr.bf16.mxu1 %v3485_v45  ;;  %v3337_v38 = vpack.c.bf16 %v2678_v40, %v2677_v5 }
 0x15e   :  { %v3172_v35 = vpop.f32.mrb[24].mxu0 }
 0x15f   :  { %v2444_v39 = vadd.f32 %v3172_v35, %v2396_v58  ;;  %v2435_v36 = vpop.f32.mrb[25].mxu0 }
 0x160   :  { %v2436_v37 = vadd.f32 %v2435_v36, %v2388_v48  ;;  %v3173_v28 = vpop.f32.mrb[26].mxu0  ;;  %3332 = vmatpush3.bf16.msra.mxu1 %v3331_v31 }
 0x161   :  { %v2438_v42 = vpop.f32.mrb[27].mxu0  ;;  %3333 = vmatprep.subr.bf16.mxu1 %v3485_v45  ;;  %v2454_v44 = vcombine.high %v2444_v39, %v2444_v39 }
 0x162   :  { %v2452_v43 = vcombine.high %v2436_v37, %v2436_v37  ;;  %v2439_v32 = vadd.f32 %v2438_v42, %v2391_v50  ;;  %v2681_v50 = vld [vmem:[%s4314_s9 + $0x50] sm:$0xff] }
 0x163   :  { %v2469_v47 = vsel %vm2460_vm4, %v2454_v44, -inf  ;;  %v3343_v56 = vpack.c.bf16 %v2682_v52, %v2681_v50 }
 0x164   :  { %v2456_v29 = vcombine.low %v2436_v37, %v2452_v43  ;;  %v2453_v54 = vcombine.high %v2439_v32, %v2439_v32  ;;  %v2461_v55 = vsel %vm2460_vm4, %v2439_v32, -inf  ;;  %3335 = vmatpush3.bf16.msra.mxu1 %v3334_v41 }
 0x165   :  { %3336 = vmatprep.subr.bf16.mxu1 %v3485_v45 }
 0x166   :  { %v2457_v4 = vcombine.low %v2453_v54, %v2444_v39  ;;  %v2462_v62 = vmax.f32 %v2456_v29, %v2461_v55 }
 0x168   :  { %v2463_v48 = vrot.slane %v2462_v62, 4  ;;  %v2470_v1 = vmax.f32 %v2457_v4, %v2469_v47  ;;  %3338 = vmatpush3.bf16.msra.mxu1 %v3337_v38 }
 0x169   :  { %3339 = vmatprep.subr.bf16.mxu1 %v3485_v45 }
 0x16a   :  { %v2464_v53 = vmax.f32 %v2462_v62, %v2463_v48  ;;  %v2471_v51 = vrot.slane %v2470_v1, 4 }
 0x16c   :  { %v2465_v2 = vrot.slane %v2464_v53, 2  ;;  %v2472_v27 = vmax.f32 %v2470_v1, %v2471_v51  ;;  %3341 = vmatpush3.bf16.msra.mxu1 %v3340_v49 }
 0x16d   :  { %3342 = vmatprep.subr.bf16.mxu1 %v3485_v45 }
 0x16e   :  { %v2466_v6 = vmax.f32 %v2464_v53, %v2465_v2  ;;  %v2473_v8 = vrot.slane %v2472_v27, 2 }
 0x170   :  { %v2467_v46 = vrot.slane %v2466_v6, 1  ;;  %v2474_v61 = vmax.f32 %v2472_v27, %v2473_v8  ;;  %3344 = vmatpush3.bf16.msra.mxu1 %v3343_v56 }
 0x171   :  { %3345 = vmatprep.subr.bf16.mxu1 %v3485_v45 }
 0x172   :  { %v2468_v58 = vmax.f32 %v2466_v6, %v2467_v46  ;;  %v2475_v7 = vrot.slane %v2474_v61, 1 }
 0x174   :  { %3347 = vmatpush3.bf16.msra.mxu1 %v3346_v9  ;;  %v2476_v14 = vmax.f32 %v2474_v61, %v2475_v7  ;;  %v2484_v15 = vadd.f32 %v2921_v12, %v2468_v58 }
 0x175   :  { %3348 = vmatprep.subr.bf16.mxu1 %v3485_v45  ;;  %v2922_v45 = vld [vmem:[%s4315_s10] ss:$0 sm:$0xff]  ;;  %s2795_s10 = sshll.u32 %s3488_s29, 4  ;;  %s2796_s10 = int_to_ptr.vmem [resolvable:$true] %s2795_s10 }
 0x176   :  { %v2485_v16 = vadd.f32 %v2921_v12, %v2476_v14  ;;  %v2486_v18 = vmax.f32 %v2484_v15, 0.0  ;;  %s3459_s30 = scalar_lea.vmem %s2796_s10, 32  ;;  %p3464_p1 = scmp.lt.s32.totalorder %s2796_s10, %s2796_s10 }
 0x177   :  { %p3460_p0 = scmp.ne.s32.totalorder %s2796_s10, %s3459_s30  ;;  %p3465_p2 = scmp.lt.s32.totalorder %s3459_s30, %s3459_s30 }
 0x178   :  { %3350 = vmatpush3.bf16.msra.mxu1 %v3349_v13  ;;  %v2487_v17 = vmax.f32 %v2485_v16, 0.0 }
 0x179   :  { %p3466_p3 = por %p3465_p2, %p3464_p1 }
 0x17a   :  { %v2689_v63 = vrot.slane %v2487_v17, 7 }
 0x17b   :  { %p3467_p4 = pnand %p3466_p3, %p3460_p0 }
 0x17c   :  { %v2690_v0 = vsel %vm2523_vm3, %v2689_v63, %v2486_v18 }
 0x17d   :  { %3277 = vmatmul.mubr.f32.vlgmr.msra.gmra.mrb[22].mxu1 %v2690_v0 }
 0x20e   :  { %v2667_v19 = vpop.f32.mrb[28].mxu0 }
 0x20f   :  { %v3243_v20 = vpop.f32.mrb[29].mxu0 }
 0x22e   :  { %v2592_v22 = vpop.f32.mrb[20].mxu1 }
 0x22f   :  { %v2668_v23 = vadd.f32 %v2667_v19, %v2592_v22  ;;  %v3208_v24 = vpop.f32.mrb[21].mxu1 }
 0x250   :  { %v2758_v26 = vpop.f32.mrb[22].mxu1 }
 0x251   :  { %v2762_v30 = vadd.f32 %v2758_v26, %v2668_v23  ;;  %v3278_v31 = vpop.f32.mrb[23].mxu1 }
 0x253   :  { %v2770_v33 = vadd.f32 %v2922_v45, %v2762_v30 }
 0x255   :  { %v2774_v34 = vsel %vm2773_vm5, %v2770_v33, -1e+30 }
 0x256   :  { %v2776_v35 = vsel %vm2775_vm6, %v2774_v34, -inf }
 0x257   :  { %2777 = vmax.xlane.f32.xlu0 %v2776_v35 }
 0x2e4   :  { %v2778_v39 = vpop.xlane.xlu0 %2777 }
 0x2e5   :  { %v2779_v36 = vsub.f32 %v2774_v34, %v2778_v39 }
 0x2e7   :  { %v2780_v37 = vmul.f32 1.442695, %v2779_v36 }
 0x2e9   :  { %3455 = vpow2.f32 %v2780_v37 }
 0x2f3   :  { %v3456_v28 = vpop.eup %3455 }
 0x2f4   :  { %v2782_v41 = vsel %vm2775_vm6, %v3456_v28, 0.0 }
 0x2f5   :  { %2783 = vadd.xlane.f32.xlu0 %v2782_v41 }
 0x382   :  { %v2784_v21 = vpop.xlane.xlu0 %2783 }
 0x383   :  { %3457 = vlog2.f32 %v2784_v21 }
 0x38d   :  { %v3458_v42 = vpop.eup %3457 }
 0x38e   :  { %v2786_v5 = vmul.f32 0.6931472, %v3458_v42 }
 0x390   :  { %v2787_v40 = vsub.f32 %v2779_v36, %v2786_v5 }
 0x392   :  { %2788 = vst [vmem:[#allocation2] sm:$0x3] %v2787_v40 }
 0x393   :  { %3470 = shalt.err (!%p3467_p4)
}
 0x394   :  { %s3471_s13 = scalar_lea.hbm %s4316_s11, 32 }
 0x395   :  { %p3472_p5 = scmp.ne.s32.totalorder %s4316_s11, %s3471_s13  ;;  %p3475_p6 = scmp.lt.u32.totalorder %s3471_s13, %s4316_s11 }
 0x397   :  { %p3477_p7 = pnand %p3475_p6, %p3472_p5 }
 0x399   :  { %3480 = shalt.err (!%p3477_p7)
}
 0x39a   :  { %2798 = dma.vmem_to_hbm [thread:$0]  %s2796_s10, 32, %s4316_s11, [#allocation3]  }
 0x39b   :  { %3481 = dma.done.wait [#allocation3], 32  }
 0x39c   :  { %3482 = vsyncadd [#allocation3], 4294967264 }
 0x39d   :  { %2802 = vsyncpa [#allocation3], 1 }

</bundles_post_ra>
